<compile_context>
chip_gen: v7x
topology: tpu7x:2x2x1
jax: 0.10.0
libtpu: 0.0.40
codegen_flags: <defaults>
</compile_context>

<pallas_src>
import functools

import numpy as np

import jax
import jax.numpy as jnp
from jax import lax
from jax.experimental import pallas as pl
from jax.experimental.pallas import tpu as pltpu

_NEG = -1.0e30  # "log zero" that stays finite (avoids inf-inf NaNs)


def _ctc_kernel(len_ref, slen_ref, acts_ref, ext_ref, cost_ref,
                alpha_ref, g_ref, *, blank, num_classes, spad_pad,
                t_blk, batch_blk):
  """CTC forward for one (batch_blk, t_blk) tile.

  len_ref   : VMEM (B, 1)       int32  valid time steps per row (clamped to T)
  slen_ref  : VMEM (B, 1)       int32  2*label_len + 1 per row
  acts_ref  : VMEM (B, Tb, C)   native-dtype logits chunk
  ext_ref   : VMEM (B, Spad)    int32  extended labels [blank,l1,blank,...]
  cost_ref  : VMEM (B, 128)     float32 per-sample NLL (broadcast across lanes)
  alpha_ref : VMEM (B, Spad)    float32 scratch, alpha carried across chunks
  g_ref     : VMEM (B*Tb, Spad) float32 scratch, gathered log-probs (row b*Tb+t)
  """
  j = pl.program_id(1)
  num_t = pl.num_programs(1)

  t_in = len_ref[...]                     # (B, 1) int32
  s_len = slen_ref[...]                   # (B, 1) int32
  ext = ext_ref[...]                      # (B, Spad) int32

  s_iota = lax.broadcasted_iota(jnp.int32, (batch_blk, spad_pad), 1)

  # skip transition s-2 -> s allowed iff s>=2, l'[s] != blank, l'[s] != l'[s-2]
  ext_m2 = pltpu.roll(ext, shift=2, axis=1)
  skip_ok = (s_iota >= 2) & (ext != blank) & (ext != ext_m2)
  can_shift1 = s_iota >= 1

  # ---- per-row log-softmax + one-hot gather (MXU), staged t-contiguous ------
  class_iota = lax.broadcasted_iota(jnp.int32, (num_classes, spad_pad), 0)
  for b in range(batch_blk):              # static loop, outside serial path
    ab = acts_ref[b].astype(jnp.float32)                     # (Tb, C)
    mx = jnp.max(ab, axis=-1, keepdims=True)
    sh = ab - mx
    lp = sh - jnp.log(jnp.sum(jnp.exp(sh), axis=-1, keepdims=True))
    onehot_b = (class_iota == ext_ref[pl.ds(b, 1), :]).astype(jnp.float32)
    g_ref[pl.ds(b * t_blk, t_blk), :] = jnp.dot(
        lp, onehot_b, preferred_element_type=jnp.float32)    # (Tb, Spad)

  # ---- init alpha at the first chunk of each batch block --------------------
  # Virtual alpha_{-1}: log(1) at state 0, log(0) elsewhere.  One recursion
  # step then reproduces the canonical t=0 init (alpha0(0)=lp(blank),
  # alpha0(1)=lp(l1)).
  @pl.when(j == 0)
  def _():
    alpha_ref[...] = jnp.where(s_iota == 0, 0.0, _NEG).astype(jnp.float32)

  alpha = alpha_ref[...]

  # ---- static, fully unrolled time recursion for this chunk ------------------
  t_base = j * t_blk
  for tt in range(t_blk):
    # row k of this slab is batch row k at local time tt (strided sublane load)
    gt = g_ref[pl.ds(tt, batch_blk, stride=t_blk), :]        # (B, Spad)
    a1 = jnp.where(can_shift1, pltpu.roll(alpha, shift=1, axis=1), _NEG)
    a2 = jnp.where(skip_ok, pltpu.roll(alpha, shift=2, axis=1), _NEG)
    m = jnp.maximum(jnp.maximum(alpha, a1), a2)
    lse = m + jnp.log(jnp.exp(alpha - m) + jnp.exp(a1 - m) + jnp.exp(a2 - m))
    lse = jnp.where(m > 0.5 * _NEG, lse, _NEG)               # keep "log zero" exact
    new_alpha = lse + gt
    # per-row ragged-length mask (also covers time padding)
    alpha = jnp.where(t_base + tt < t_in, new_alpha, alpha)

  alpha_ref[...] = alpha

  # ---- finalize: -log P = -logsumexp(alpha[S-1], alpha[S-2]) -----------------
  @pl.when(j == num_t - 1)
  def _():
    a_last = jnp.max(jnp.where(s_iota == s_len - 1, alpha, _NEG),
                     axis=1, keepdims=True)
    a_prev = jnp.max(jnp.where(s_iota == s_len - 2, alpha, _NEG),
                     axis=1, keepdims=True)
    mm = jnp.maximum(a_last, a_prev)
    ll = mm + jnp.log(jnp.exp(a_last - mm) + jnp.exp(a_prev - mm))
    cost_ref[...] = jnp.broadcast_to(-ll, (batch_blk, 128))


def ctc_loss(activations, labels, lengths, label_lengths,
             take_average=True, blank=None, max_label_len=None,
             batch_block=8, time_block=32):
  """Mirrors CTCLoss.forward: returns a shape-(1,) float32 array."""
  n, t, c = activations.shape
  if blank is None:
    blank = c - 1
  blank = int(blank)
  if max_label_len is None:
    # TODO(synk): host sync + retrace; pass max_label_len for a jit-friendly path.
    max_label_len = int(jnp.max(label_lengths))
  lmax = max(int(max_label_len), 0)
  spad = 2 * lmax + 1
  spad_pad = ((spad + 127) // 128) * 128

  bb = max(8, (int(batch_block) // 8) * 8)
  n_pad = ((n + bb - 1) // bb) * bb
  tb = min(int(time_block), ((t + 7) // 8) * 8)
  tb = max(8, (tb // 8) * 8)
  t_pad = ((t + tb - 1) // tb) * tb

  labels = jnp.asarray(labels, jnp.int32).reshape(-1)
  lengths = jnp.asarray(lengths, jnp.int32).reshape(-1)
  label_lengths = jnp.asarray(label_lengths, jnp.int32).reshape(-1)

  lens = jnp.minimum(lengths, t)                 # bound-check vs T
  lls = jnp.minimum(label_lengths, lmax)

  # glue: flat concatenated labels -> padded (N, Lmax) -> extended labels
  offsets = jnp.concatenate(
      [jnp.zeros((1,), jnp.int32), jnp.cumsum(label_lengths)[:-1]])
  ext = jnp.full((n, spad_pad), blank, dtype=jnp.int32)
  if lmax > 0 and labels.shape[0] > 0:
    pos = jnp.arange(lmax, dtype=jnp.int32)
    idx = offsets[:, None] + pos[None, :]
    valid = pos[None, :] < lls[:, None]
    nf = labels.shape[0]
    padded = jnp.where(valid, labels[jnp.clip(idx, 0, nf - 1)], blank)
    ext = ext.at[:, 1:2 * lmax:2].set(padded.astype(jnp.int32))

  # pad batch / time (native dtype kept; padded rows have length 0 -> cost 0)
  acts_p = jnp.pad(activations, ((0, n_pad - n), (0, t_pad - t), (0, 0)))
  ext_p = jnp.pad(ext, ((0, n_pad - n), (0, 0)), constant_values=blank)
  lens_p = jnp.pad(lens, (0, n_pad - n)).reshape(n_pad, 1).astype(jnp.int32)
  slen_p = (2 * jnp.pad(lls, (0, n_pad - n)) + 1).reshape(n_pad, 1).astype(jnp.int32)

  kernel = functools.partial(_ctc_kernel, blank=blank, num_classes=c,
                             spad_pad=spad_pad, t_blk=tb, batch_blk=bb)

  grid = (n_pad // bb, t_pad // tb)
  grid_spec = pltpu.PrefetchScalarGridSpec(
      num_scalar_prefetch=0,
      grid=grid,
      in_specs=[
          pl.BlockSpec((bb, 1), lambda i, j: (i, 0)),            # lengths
          pl.BlockSpec((bb, 1), lambda i, j: (i, 0)),            # 2*L+1
          pl.BlockSpec((bb, tb, c), lambda i, j: (i, j, 0)),     # activations
          pl.BlockSpec((bb, spad_pad), lambda i, j: (i, 0)),     # extended labels
      ],
      out_specs=pl.BlockSpec((bb, 128), lambda i, j: (i, 0)),
      scratch_shapes=[
          pltpu.VMEM((bb, spad_pad), jnp.float32),               # alpha carry
          pltpu.VMEM((bb * tb, spad_pad), jnp.float32),          # gathered logp
      ],
  )

  costs = pl.pallas_call(
      kernel,
      grid_spec=grid_spec,
      out_shape=jax.ShapeDtypeStruct((n_pad, 128), jnp.float32),
      compiler_params=pltpu.CompilerParams(
          dimension_semantics=("parallel", "arbitrary"),
          vmem_limit_bytes=32 * 1024 * 1024),
  )(lens_p, slen_p, acts_p, ext_p)

  cost = jnp.sum(costs[:n, 0])
  if take_average:
    cost = cost / n
  return jnp.reshape(cost, (1,)).astype(jnp.float32)


# ---------------- pure-numpy reference (for correctness check) --------------
def _ctc_ref(acts, labels_flat, lengths, label_lengths, blank, take_average):
  acts = np.asarray(acts, dtype=np.float64)
  n = acts.shape[0]
  costs = np.zeros(n, dtype=np.float64)
  off = 0
  for b in range(n):
    tn = int(lengths[b]); ll = int(label_lengths[b])
    lab = [int(v) for v in labels_flat[off:off + ll]]; off += ll
    x = acts[b, :tn]
    mx = x.max(axis=-1, keepdims=True)
    lp = x - mx - np.log(np.exp(x - mx).sum(axis=-1, keepdims=True))
    ext = [blank]
    for v in lab:
      ext += [v, blank]
    s = 2 * ll + 1
    alpha = np.full(s, -np.inf)
    alpha[0] = lp[0, blank]
    if s > 1:
      alpha[1] = lp[0, ext[1]]
    for t in range(1, tn):
      new = np.full(s, -np.inf)
      for si in range(s):
        v = alpha[si]
        if si >= 1:
          v = np.logaddexp(v, alpha[si - 1])
        if si >= 2 and ext[si] != blank and ext[si] != ext[si - 2]:
          v = np.logaddexp(v, alpha[si - 2])
        new[si] = v + lp[t, ext[si]]
      alpha = new
    loglik = alpha[s - 1]
    if s > 1:
      loglik = np.logaddexp(loglik, alpha[s - 2])
    costs[b] = -loglik
  total = costs.sum()
  if take_average:
    total /= n
  return float(total)


if __name__ == "__main__":
  key = jax.random.PRNGKey(0)
  k1, k2 = jax.random.split(key)

  N, T, C = 2, 8, 32
  activations = jax.random.normal(k1, (N, T, C), dtype=jnp.float32)
  label_lengths = jnp.array([3, 2], dtype=jnp.int32)
  lengths = jnp.array([8, 6], dtype=jnp.int32)
  # labels never use the blank class (C-1)
  labels = jax.random.randint(k2, (int(np.sum(np.asarray(label_lengths))),),
                              0, C - 1, dtype=jnp.int32)

  out = ctc_loss(activations, labels, lengths, label_lengths,
                 take_average=True, blank=None, max_label_len=3)
  out = jax.block_until_ready(out)

  ref = _ctc_ref(np.asarray(activations), np.asarray(labels),
                 np.asarray(lengths), np.asarray(label_lengths),
                 blank=C - 1, take_average=True)

  assert out.shape == (1,) and out.dtype == jnp.float32
  assert abs(float(out[0]) - ref) <= 1e-3 * max(1.0, abs(ref)), (float(out[0]), ref)
  print("KERNEL_OK")
</pallas_src>

<mosaic_0001>
module attributes {stable_mosaic.version = 11 : i64} {
  func.func @_ctc_kernel(%arg0: i32, %arg1: i32, %arg2: memref<8x1xi32, #tpu.memory_space<vmem>>, %arg3: memref<8x1xi32, #tpu.memory_space<vmem>>, %arg4: memref<8x8x32xf32, #tpu.memory_space<vmem>>, %arg5: memref<8x128xi32, #tpu.memory_space<vmem>>, %arg6: memref<8x128xf32, #tpu.memory_space<vmem>>, %arg7: memref<8x128xf32, #tpu.memory_space<vmem>>, %arg8: memref<64x128xf32, #tpu.memory_space<vmem>>) attributes {dimension_semantics = [#tpu.dimension_semantics<parallel>, #tpu.dimension_semantics<arbitrary>], iteration_bounds = array<i64: 1, 1>, scalar_prefetch = 0 : i64, scratch_operands = 2 : i64, tpu.core_type = #tpu.core_type<tc>, window_params = [{transform_indices = @transform_0, window_bounds = array<i64: 8, 1>}, {transform_indices = @transform_1, window_bounds = array<i64: 8, 1>}, {transform_indices = @transform_2, window_bounds = array<i64: 8, 8, 32>}, {transform_indices = @transform_3, window_bounds = array<i64: 8, 128>}, {transform_indices = @transform_4, window_bounds = array<i64: 8, 128>}]} {
    %c0 = arith.constant 0 : index
    %c0_0 = arith.constant 0 : index
    %0 = vector.load %arg2[%c0, %c0_0] : memref<8x1xi32, #tpu.memory_space<vmem>>, vector<8x1xi32>
    %c0_1 = arith.constant 0 : index
    %c0_2 = arith.constant 0 : index
    %1 = vector.load %arg3[%c0_1, %c0_2] : memref<8x1xi32, #tpu.memory_space<vmem>>, vector<8x1xi32>
    %c0_3 = arith.constant 0 : index
    %c0_4 = arith.constant 0 : index
    %2 = vector.load %arg5[%c0_3, %c0_4] : memref<8x128xi32, #tpu.memory_space<vmem>>, vector<8x128xi32>
    %3 = tpu.iota {dimensions = array<i32: 1>} : vector<8x128xi32>
    %c2_i32 = arith.constant 2 : i32
    %4 = tpu.dynamic_rotate %2 by %c2_i32 dim 1 : vector<8x128xi32>, i32 -> vector<8x128xi32>
    %c2_i32_5 = arith.constant 2 : i32
    %5 = vector.broadcast %c2_i32_5 : i32 to vector<8x128xi32>
    %6 = arith.cmpi sge, %3, %5 : vector<8x128xi32>
    %c31_i32 = arith.constant 31 : i32
    %7 = vector.broadcast %c31_i32 : i32 to vector<8x128xi32>
    %8 = arith.cmpi ne, %2, %7 : vector<8x128xi32>
    %9 = arith.andi %6, %8 : vector<8x128xi1>
    %10 = arith.cmpi ne, %2, %4 : vector<8x128xi32>
    %11 = arith.andi %9, %10 : vector<8x128xi1>
    %c1_i32 = arith.constant 1 : i32
    %12 = vector.broadcast %c1_i32 : i32 to vector<8x128xi32>
    %13 = arith.cmpi sge, %3, %12 : vector<8x128xi32>
    %14 = tpu.iota {dimensions = array<i32: 0>} : vector<32x128xi32>
    %c0_6 = arith.constant 0 : index
    %c0_7 = arith.constant 0 : index
    %c0_8 = arith.constant 0 : index
    %15 = vector.load %arg4[%c0_6, %c0_7, %c0_8] : memref<8x8x32xf32, #tpu.memory_space<vmem>>, vector<1x8x32xf32>
    %16 = vector.shape_cast %15 : vector<1x8x32xf32> to vector<8x32xf32>
    %cst = arith.constant dense<0xFF800000> : vector<8xf32>
    %17 = vector.multi_reduction <maximumf>, %16, %cst [1] : vector<8x32xf32> to vector<8xf32>
    %18 = vector.shape_cast %17 : vector<8xf32> to vector<8x1xf32>
    %19 = vector.broadcast %18 : vector<8x1xf32> to vector<8x32xf32>
    %20 = arith.subf %16, %19 : vector<8x32xf32>
    %21 = math.exp %20 : vector<8x32xf32>
    %cst_9 = arith.constant dense<0.000000e+00> : vector<8xf32>
    %22 = vector.multi_reduction <add>, %21, %cst_9 [1] : vector<8x32xf32> to vector<8xf32>
    %23 = vector.shape_cast %22 : vector<8xf32> to vector<8x1xf32>
    %24 = math.log %23 : vector<8x1xf32>
    %25 = vector.broadcast %24 : vector<8x1xf32> to vector<8x32xf32>
    %26 = arith.subf %20, %25 : vector<8x32xf32>
    %c0_10 = arith.constant 0 : index
    %c0_11 = arith.constant 0 : index
    %27 = vector.load %arg5[%c0_10, %c0_11] : memref<8x128xi32, #tpu.memory_space<vmem>>, vector<1x128xi32>
    %28 = vector.broadcast %27 : vector<1x128xi32> to vector<32x128xi32>
    %29 = arith.cmpi eq, %14, %28 : vector<32x128xi32>
    %30 = arith.extui %29 : vector<32x128xi1> to vector<32x128xi32>
    %31 = arith.sitofp %30 : vector<32x128xi32> to vector<32x128xf32>
    %cst_12 = arith.constant dense<0.000000e+00> : vector<8x128xf32>
    %32 = tpu.matmul %26, %31, %cst_12 {dimension_numbers = #tpu.dot_dimension_numbers<[1], [0], [0], [1], [0, 0, 1, 1], [], []>} : vector<8x32xf32>, vector<32x128xf32>, vector<8x128xf32> -> vector<8x128xf32>
    %c0_13 = arith.constant 0 : index
    %c0_14 = arith.constant 0 : index
    %33 = vector.load %arg8[%c0_13, %c0_14] : memref<64x128xf32, #tpu.memory_space<vmem>>, vector<8x128xf32>
    tpu.vector_store %arg8[%c0_13, %c0_14], %32 {strides = array<i32>} : memref<64x128xf32, #tpu.memory_space<vmem>>, vector<8x128xf32>,
    %c1 = arith.constant 1 : index
    %c0_15 = arith.constant 0 : index
    %c0_16 = arith.constant 0 : index
    %34 = vector.load %arg4[%c1, %c0_15, %c0_16] : memref<8x8x32xf32, #tpu.memory_space<vmem>>, vector<1x8x32xf32>
    %35 = vector.shape_cast %34 : vector<1x8x32xf32> to vector<8x32xf32>
    %cst_17 = arith.constant dense<0xFF800000> : vector<8xf32>
    %36 = vector.multi_reduction <maximumf>, %35, %cst_17 [1] : vector<8x32xf32> to vector<8xf32>
    %37 = vector.shape_cast %36 : vector<8xf32> to vector<8x1xf32>
    %38 = vector.broadcast %37 : vector<8x1xf32> to vector<8x32xf32>
    %39 = arith.subf %35, %38 : vector<8x32xf32>
    %40 = math.exp %39 : vector<8x32xf32>
    %cst_18 = arith.constant dense<0.000000e+00> : vector<8xf32>
    %41 = vector.multi_reduction <add>, %40, %cst_18 [1] : vector<8x32xf32> to vector<8xf32>
    %42 = vector.shape_cast %41 : vector<8xf32> to vector<8x1xf32>
    %43 = math.log %42 : vector<8x1xf32>
    %44 = vector.broadcast %43 : vector<8x1xf32> to vector<8x32xf32>
    %45 = arith.subf %39, %44 : vector<8x32xf32>
    %c1_19 = arith.constant 1 : index
    %c0_20 = arith.constant 0 : index
    %46 = vector.load %arg5[%c1_19, %c0_20] : memref<8x128xi32, #tpu.memory_space<vmem>>, vector<1x128xi32>
    %47 = vector.broadcast %46 : vector<1x128xi32> to vector<32x128xi32>
    %48 = arith.cmpi eq, %14, %47 : vector<32x128xi32>
    %49 = arith.extui %48 : vector<32x128xi1> to vector<32x128xi32>
    %50 = arith.sitofp %49 : vector<32x128xi32> to vector<32x128xf32>
    %cst_21 = arith.constant dense<0.000000e+00> : vector<8x128xf32>
    %51 = tpu.matmul %45, %50, %cst_21 {dimension_numbers = #tpu.dot_dimension_numbers<[1], [0], [0], [1], [0, 0, 1, 1], [], []>} : vector<8x32xf32>, vector<32x128xf32>, vector<8x128xf32> -> vector<8x128xf32>
    %c8 = arith.constant 8 : index
    %c0_22 = arith.constant 0 : index
    %52 = vector.load %arg8[%c8, %c0_22] : memref<64x128xf32, #tpu.memory_space<vmem>>, vector<8x128xf32>
    tpu.vector_store %arg8[%c8, %c0_22], %51 {strides = array<i32>} : memref<64x128xf32, #tpu.memory_space<vmem>>, vector<8x128xf32>,
    %c2 = arith.constant 2 : index
    %c0_23 = arith.constant 0 : index
    %c0_24 = arith.constant 0 : index
    %53 = vector.load %arg4[%c2, %c0_23, %c0_24] : memref<8x8x32xf32, #tpu.memory_space<vmem>>, vector<1x8x32xf32>
    %54 = vector.shape_cast %53 : vector<1x8x32xf32> to vector<8x32xf32>
    %cst_25 = arith.constant dense<0xFF800000> : vector<8xf32>
    %55 = vector.multi_reduction <maximumf>, %54, %cst_25 [1] : vector<8x32xf32> to vector<8xf32>
    %56 = vector.shape_cast %55 : vector<8xf32> to vector<8x1xf32>
    %57 = vector.broadcast %56 : vector<8x1xf32> to vector<8x32xf32>
    %58 = arith.subf %54, %57 : vector<8x32xf32>
    %59 = math.exp %58 : vector<8x32xf32>
    %cst_26 = arith.constant dense<0.000000e+00> : vector<8xf32>
    %60 = vector.multi_reduction <add>, %59, %cst_26 [1] : vector<8x32xf32> to vector<8xf32>
    %61 = vector.shape_cast %60 : vector<8xf32> to vector<8x1xf32>
    %62 = math.log %61 : vector<8x1xf32>
    %63 = vector.broadcast %62 : vector<8x1xf32> to vector<8x32xf32>
    %64 = arith.subf %58, %63 : vector<8x32xf32>
    %c2_27 = arith.constant 2 : index
    %c0_28 = arith.constant 0 : index
    %65 = vector.load %arg5[%c2_27, %c0_28] : memref<8x128xi32, #tpu.memory_space<vmem>>, vector<1x128xi32>
    %66 = vector.broadcast %65 : vector<1x128xi32> to vector<32x128xi32>
    %67 = arith.cmpi eq, %14, %66 : vector<32x128xi32>
    %68 = arith.extui %67 : vector<32x128xi1> to vector<32x128xi32>
    %69 = arith.sitofp %68 : vector<32x128xi32> to vector<32x128xf32>
    %cst_29 = arith.constant dense<0.000000e+00> : vector<8x128xf32>
    %70 = tpu.matmul %64, %69, %cst_29 {dimension_numbers = #tpu.dot_dimension_numbers<[1], [0], [0], [1], [0, 0, 1, 1], [], []>} : vector<8x32xf32>, vector<32x128xf32>, vector<8x128xf32> -> vector<8x128xf32>
    %c16 = arith.constant 16 : index
    %c0_30 = arith.constant 0 : index
    %71 = vector.load %arg8[%c16, %c0_30] : memref<64x128xf32, #tpu.memory_space<vmem>>, vector<8x128xf32>
    tpu.vector_store %arg8[%c16, %c0_30], %70 {strides = array<i32>} : memref<64x128xf32, #tpu.memory_space<vmem>>, vector<8x128xf32>,
    %c3 = arith.constant 3 : index
    %c0_31 = arith.constant 0 : index
    %c0_32 = arith.constant 0 : index
    %72 = vector.load %arg4[%c3, %c0_31, %c0_32] : memref<8x8x32xf32, #tpu.memory_space<vmem>>, vector<1x8x32xf32>
    %73 = vector.shape_cast %72 : vector<1x8x32xf32> to vector<8x32xf32>
    %cst_33 = arith.constant dense<0xFF800000> : vector<8xf32>
    %74 = vector.multi_reduction <maximumf>, %73, %cst_33 [1] : vector<8x32xf32> to vector<8xf32>
    %75 = vector.shape_cast %74 : vector<8xf32> to vector<8x1xf32>
    %76 = vector.broadcast %75 : vector<8x1xf32> to vector<8x32xf32>
    %77 = arith.subf %73, %76 : vector<8x32xf32>
    %78 = math.exp %77 : vector<8x32xf32>
    %cst_34 = arith.constant dense<0.000000e+00> : vector<8xf32>
    %79 = vector.multi_reduction <add>, %78, %cst_34 [1] : vector<8x32xf32> to vector<8xf32>
    %80 = vector.shape_cast %79 : vector<8xf32> to vector<8x1xf32>
    %81 = math.log %80 : vector<8x1xf32>
    %82 = vector.broadcast %81 : vector<8x1xf32> to vector<8x32xf32>
    %83 = arith.subf %77, %82 : vector<8x32xf32>
    %c3_35 = arith.constant 3 : index
    %c0_36 = arith.constant 0 : index
    %84 = vector.load %arg5[%c3_35, %c0_36] : memref<8x128xi32, #tpu.memory_space<vmem>>, vector<1x128xi32>
    %85 = vector.broadcast %84 : vector<1x128xi32> to vector<32x128xi32>
    %86 = arith.cmpi eq, %14, %85 : vector<32x128xi32>
    %87 = arith.extui %86 : vector<32x128xi1> to vector<32x128xi32>
    %88 = arith.sitofp %87 : vector<32x128xi32> to vector<32x128xf32>
    %cst_37 = arith.constant dense<0.000000e+00> : vector<8x128xf32>
    %89 = tpu.matmul %83, %88, %cst_37 {dimension_numbers = #tpu.dot_dimension_numbers<[1], [0], [0], [1], [0, 0, 1, 1], [], []>} : vector<8x32xf32>, vector<32x128xf32>, vector<8x128xf32> -> vector<8x128xf32>
    %c24 = arith.constant 24 : index
    %c0_38 = arith.constant 0 : index
    %90 = vector.load %arg8[%c24, %c0_38] : memref<64x128xf32, #tpu.memory_space<vmem>>, vector<8x128xf32>
    tpu.vector_store %arg8[%c24, %c0_38], %89 {strides = array<i32>} : memref<64x128xf32, #tpu.memory_space<vmem>>, vector<8x128xf32>,
    %c4 = arith.constant 4 : index
    %c0_39 = arith.constant 0 : index
    %c0_40 = arith.constant 0 : index
    %91 = vector.load %arg4[%c4, %c0_39, %c0_40] : memref<8x8x32xf32, #tpu.memory_space<vmem>>, vector<1x8x32xf32>
    %92 = vector.shape_cast %91 : vector<1x8x32xf32> to vector<8x32xf32>
    %cst_41 = arith.constant dense<0xFF800000> : vector<8xf32>
    %93 = vector.multi_reduction <maximumf>, %92, %cst_41 [1] : vector<8x32xf32> to vector<8xf32>
    %94 = vector.shape_cast %93 : vector<8xf32> to vector<8x1xf32>
    %95 = vector.broadcast %94 : vector<8x1xf32> to vector<8x32xf32>
    %96 = arith.subf %92, %95 : vector<8x32xf32>
    %97 = math.exp %96 : vector<8x32xf32>
    %cst_42 = arith.constant dense<0.000000e+00> : vector<8xf32>
    %98 = vector.multi_reduction <add>, %97, %cst_42 [1] : vector<8x32xf32> to vector<8xf32>
    %99 = vector.shape_cast %98 : vector<8xf32> to vector<8x1xf32>
    %100 = math.log %99 : vector<8x1xf32>
    %101 = vector.broadcast %100 : vector<8x1xf32> to vector<8x32xf32>
    %102 = arith.subf %96, %101 : vector<8x32xf32>
    %c4_43 = arith.constant 4 : index
    %c0_44 = arith.constant 0 : index
    %103 = vector.load %arg5[%c4_43, %c0_44] : memref<8x128xi32, #tpu.memory_space<vmem>>, vector<1x128xi32>
    %104 = vector.broadcast %103 : vector<1x128xi32> to vector<32x128xi32>
    %105 = arith.cmpi eq, %14, %104 : vector<32x128xi32>
    %106 = arith.extui %105 : vector<32x128xi1> to vector<32x128xi32>
    %107 = arith.sitofp %106 : vector<32x128xi32> to vector<32x128xf32>
    %cst_45 = arith.constant dense<0.000000e+00> : vector<8x128xf32>
    %108 = tpu.matmul %102, %107, %cst_45 {dimension_numbers = #tpu.dot_dimension_numbers<[1], [0], [0], [1], [0, 0, 1, 1], [], []>} : vector<8x32xf32>, vector<32x128xf32>, vector<8x128xf32> -> vector<8x128xf32>
    %c32 = arith.constant 32 : index
    %c0_46 = arith.constant 0 : index
    %109 = vector.load %arg8[%c32, %c0_46] : memref<64x128xf32, #tpu.memory_space<vmem>>, vector<8x128xf32>
    tpu.vector_store %arg8[%c32, %c0_46], %108 {strides = array<i32>} : memref<64x128xf32, #tpu.memory_space<vmem>>, vector<8x128xf32>,
    %c5 = arith.constant 5 : index
    %c0_47 = arith.constant 0 : index
    %c0_48 = arith.constant 0 : index
    %110 = vector.load %arg4[%c5, %c0_47, %c0_48] : memref<8x8x32xf32, #tpu.memory_space<vmem>>, vector<1x8x32xf32>
    %111 = vector.shape_cast %110 : vector<1x8x32xf32> to vector<8x32xf32>
    %cst_49 = arith.constant dense<0xFF800000> : vector<8xf32>
    %112 = vector.multi_reduction <maximumf>, %111, %cst_49 [1] : vector<8x32xf32> to vector<8xf32>
    %113 = vector.shape_cast %112 : vector<8xf32> to vector<8x1xf32>
    %114 = vector.broadcast %113 : vector<8x1xf32> to vector<8x32xf32>
    %115 = arith.subf %111, %114 : vector<8x32xf32>
    %116 = math.exp %115 : vector<8x32xf32>
    %cst_50 = arith.constant dense<0.000000e+00> : vector<8xf32>
    %117 = vector.multi_reduction <add>, %116, %cst_50 [1] : vector<8x32xf32> to vector<8xf32>
    %118 = vector.shape_cast %117 : vector<8xf32> to vector<8x1xf32>
    %119 = math.log %118 : vector<8x1xf32>
    %120 = vector.broadcast %119 : vector<8x1xf32> to vector<8x32xf32>
    %121 = arith.subf %115, %120 : vector<8x32xf32>
    %c5_51 = arith.constant 5 : index
    %c0_52 = arith.constant 0 : index
    %122 = vector.load %arg5[%c5_51, %c0_52] : memref<8x128xi32, #tpu.memory_space<vmem>>, vector<1x128xi32>
    %123 = vector.broadcast %122 : vector<1x128xi32> to vector<32x128xi32>
    %124 = arith.cmpi eq, %14, %123 : vector<32x128xi32>
    %125 = arith.extui %124 : vector<32x128xi1> to vector<32x128xi32>
    %126 = arith.sitofp %125 : vector<32x128xi32> to vector<32x128xf32>
    %cst_53 = arith.constant dense<0.000000e+00> : vector<8x128xf32>
    %127 = tpu.matmul %121, %126, %cst_53 {dimension_numbers = #tpu.dot_dimension_numbers<[1], [0], [0], [1], [0, 0, 1, 1], [], []>} : vector<8x32xf32>, vector<32x128xf32>, vector<8x128xf32> -> vector<8x128xf32>
    %c40 = arith.constant 40 : index
    %c0_54 = arith.constant 0 : index
    %128 = vector.load %arg8[%c40, %c0_54] : memref<64x128xf32, #tpu.memory_space<vmem>>, vector<8x128xf32>
    tpu.vector_store %arg8[%c40, %c0_54], %127 {strides = array<i32>} : memref<64x128xf32, #tpu.memory_space<vmem>>, vector<8x128xf32>,
    %c6 = arith.constant 6 : index
    %c0_55 = arith.constant 0 : index
    %c0_56 = arith.constant 0 : index
    %129 = vector.load %arg4[%c6, %c0_55, %c0_56] : memref<8x8x32xf32, #tpu.memory_space<vmem>>, vector<1x8x32xf32>
    %130 = vector.shape_cast %129 : vector<1x8x32xf32> to vector<8x32xf32>
    %cst_57 = arith.constant dense<0xFF800000> : vector<8xf32>
    %131 = vector.multi_reduction <maximumf>, %130, %cst_57 [1] : vector<8x32xf32> to vector<8xf32>
    %132 = vector.shape_cast %131 : vector<8xf32> to vector<8x1xf32>
    %133 = vector.broadcast %132 : vector<8x1xf32> to vector<8x32xf32>
    %134 = arith.subf %130, %133 : vector<8x32xf32>
    %135 = math.exp %134 : vector<8x32xf32>
    %cst_58 = arith.constant dense<0.000000e+00> : vector<8xf32>
    %136 = vector.multi_reduction <add>, %135, %cst_58 [1] : vector<8x32xf32> to vector<8xf32>
    %137 = vector.shape_cast %136 : vector<8xf32> to vector<8x1xf32>
    %138 = math.log %137 : vector<8x1xf32>
    %139 = vector.broadcast %138 : vector<8x1xf32> to vector<8x32xf32>
    %140 = arith.subf %134, %139 : vector<8x32xf32>
    %c6_59 = arith.constant 6 : index
    %c0_60 = arith.constant 0 : index
    %141 = vector.load %arg5[%c6_59, %c0_60] : memref<8x128xi32, #tpu.memory_space<vmem>>, vector<1x128xi32>
    %142 = vector.broadcast %141 : vector<1x128xi32> to vector<32x128xi32>
    %143 = arith.cmpi eq, %14, %142 : vector<32x128xi32>
    %144 = arith.extui %143 : vector<32x128xi1> to vector<32x128xi32>
    %145 = arith.sitofp %144 : vector<32x128xi32> to vector<32x128xf32>
    %cst_61 = arith.constant dense<0.000000e+00> : vector<8x128xf32>
    %146 = tpu.matmul %140, %145, %cst_61 {dimension_numbers = #tpu.dot_dimension_numbers<[1], [0], [0], [1], [0, 0, 1, 1], [], []>} : vector<8x32xf32>, vector<32x128xf32>, vector<8x128xf32> -> vector<8x128xf32>
    %c48 = arith.constant 48 : index
    %c0_62 = arith.constant 0 : index
    %147 = vector.load %arg8[%c48, %c0_62] : memref<64x128xf32, #tpu.memory_space<vmem>>, vector<8x128xf32>
    tpu.vector_store %arg8[%c48, %c0_62], %146 {strides = array<i32>} : memref<64x128xf32, #tpu.memory_space<vmem>>, vector<8x128xf32>,
    %c7 = arith.constant 7 : index
    %c0_63 = arith.constant 0 : index
    %c0_64 = arith.constant 0 : index
    %148 = vector.load %arg4[%c7, %c0_63, %c0_64] : memref<8x8x32xf32, #tpu.memory_space<vmem>>, vector<1x8x32xf32>
    %149 = vector.shape_cast %148 : vector<1x8x32xf32> to vector<8x32xf32>
    %cst_65 = arith.constant dense<0xFF800000> : vector<8xf32>
    %150 = vector.multi_reduction <maximumf>, %149, %cst_65 [1] : vector<8x32xf32> to vector<8xf32>
    %151 = vector.shape_cast %150 : vector<8xf32> to vector<8x1xf32>
    %152 = vector.broadcast %151 : vector<8x1xf32> to vector<8x32xf32>
    %153 = arith.subf %149, %152 : vector<8x32xf32>
    %154 = math.exp %153 : vector<8x32xf32>
    %cst_66 = arith.constant dense<0.000000e+00> : vector<8xf32>
    %155 = vector.multi_reduction <add>, %154, %cst_66 [1] : vector<8x32xf32> to vector<8xf32>
    %156 = vector.shape_cast %155 : vector<8xf32> to vector<8x1xf32>
    %157 = math.log %156 : vector<8x1xf32>
    %158 = vector.broadcast %157 : vector<8x1xf32> to vector<8x32xf32>
    %159 = arith.subf %153, %158 : vector<8x32xf32>
    %c7_67 = arith.constant 7 : index
    %c0_68 = arith.constant 0 : index
    %160 = vector.load %arg5[%c7_67, %c0_68] : memref<8x128xi32, #tpu.memory_space<vmem>>, vector<1x128xi32>
    %161 = vector.broadcast %160 : vector<1x128xi32> to vector<32x128xi32>
    %162 = arith.cmpi eq, %14, %161 : vector<32x128xi32>
    %163 = arith.extui %162 : vector<32x128xi1> to vector<32x128xi32>
    %164 = arith.sitofp %163 : vector<32x128xi32> to vector<32x128xf32>
    %cst_69 = arith.constant dense<0.000000e+00> : vector<8x128xf32>
    %165 = tpu.matmul %159, %164, %cst_69 {dimension_numbers = #tpu.dot_dimension_numbers<[1], [0], [0], [1], [0, 0, 1, 1], [], []>} : vector<8x32xf32>, vector<32x128xf32>, vector<8x128xf32> -> vector<8x128xf32>
    %c56 = arith.constant 56 : index
    %c0_70 = arith.constant 0 : index
    %166 = vector.load %arg8[%c56, %c0_70] : memref<64x128xf32, #tpu.memory_space<vmem>>, vector<8x128xf32>
    tpu.vector_store %arg8[%c56, %c0_70], %165 {strides = array<i32>} : memref<64x128xf32, #tpu.memory_space<vmem>>, vector<8x128xf32>,
    %c0_i32 = arith.constant 0 : i32
    %167 = arith.cmpi eq, %arg1, %c0_i32 : i32
    %168 = arith.extui %167 : i1 to i32
    %c0_i32_71 = arith.constant 0 : i32
    %169 = arith.cmpi ne, %168, %c0_i32_71 : i32
    scf.if %169 {
      %c0_i32_145 = arith.constant 0 : i32
      %416 = vector.broadcast %c0_i32_145 : i32 to vector<8x128xi32>
      %417 = arith.cmpi eq, %3, %416 : vector<8x128xi32>
      %cst_146 = arith.constant 0.000000e+00 : f32
      %cst_147 = arith.constant -1.000000e+30 : f32
      %418 = vector.broadcast %cst_146 : f32 to vector<8x128xf32>
      %419 = vector.broadcast %cst_147 : f32 to vector<8x128xf32>
      %420 = arith.select %417, %418, %419 : vector<8x128xi1>, vector<8x128xf32>
      %c0_148 = arith.constant 0 : index
      %c0_149 = arith.constant 0 : index
      %421 = vector.load %arg7[%c0_148, %c0_149] : memref<8x128xf32, #tpu.memory_space<vmem>>, vector<8x128xf32>
      tpu.vector_store %arg7[%c0_148, %c0_149], %420 {strides = array<i32>} : memref<8x128xf32, #tpu.memory_space<vmem>>, vector<8x128xf32>,
    } else {
    }
    %c0_72 = arith.constant 0 : index
    %c0_73 = arith.constant 0 : index
    %170 = vector.load %arg7[%c0_72, %c0_73] : memref<8x128xf32, #tpu.memory_space<vmem>>, vector<8x128xf32>
    %c8_i32 = arith.constant 8 : i32
    %171 = arith.muli %arg1, %c8_i32 : i32
    %c0_74 = arith.constant 0 : index
    %c0_75 = arith.constant 0 : index
    %172 = tpu.strided_load %arg8[%c0_74, %c0_75] {strides = array<i32: 8, 1>} : memref<64x128xf32, #tpu.memory_space<vmem>>, vector<8x128xf32>
    %c1_i32_76 = arith.constant 1 : i32
    %173 = tpu.dynamic_rotate %170 by %c1_i32_76 dim 1 : vector<8x128xf32>, i32 -> vector<8x128xf32>
    %cst_77 = arith.constant -1.000000e+30 : f32
    %174 = vector.broadcast %cst_77 : f32 to vector<8x128xf32>
    %175 = arith.select %13, %173, %174 : vector<8x128xi1>, vector<8x128xf32>
    %c2_i32_78 = arith.constant 2 : i32
    %176 = tpu.dynamic_rotate %170 by %c2_i32_78 dim 1 : vector<8x128xf32>, i32 -> vector<8x128xf32>
    %cst_79 = arith.constant -1.000000e+30 : f32
    %177 = vector.broadcast %cst_79 : f32 to vector<8x128xf32>
    %178 = arith.select %11, %176, %177 : vector<8x128xi1>, vector<8x128xf32>
    %179 = arith.maximumf %170, %175 : vector<8x128xf32>
    %180 = arith.maximumf %179, %178 : vector<8x128xf32>
    %181 = arith.subf %170, %180 : vector<8x128xf32>
    %182 = math.exp %181 : vector<8x128xf32>
    %183 = arith.subf %175, %180 : vector<8x128xf32>
    %184 = math.exp %183 : vector<8x128xf32>
    %185 = arith.addf %182, %184 : vector<8x128xf32>
    %186 = arith.subf %178, %180 : vector<8x128xf32>
    %187 = math.exp %186 : vector<8x128xf32>
    %188 = arith.addf %185, %187 : vector<8x128xf32>
    %189 = math.log %188 : vector<8x128xf32>
    %190 = arith.addf %180, %189 : vector<8x128xf32>
    %cst_80 = arith.constant -5.000000e+29 : f32
    %191 = vector.broadcast %cst_80 : f32 to vector<8x128xf32>
    %192 = arith.cmpf ogt, %180, %191 : vector<8x128xf32>
    %cst_81 = arith.constant -1.000000e+30 : f32
    %193 = vector.broadcast %cst_81 : f32 to vector<8x128xf32>
    %194 = arith.select %192, %190, %193 : vector<8x128xi1>, vector<8x128xf32>
    %195 = arith.addf %194, %172 : vector<8x128xf32>
    %c0_i32_82 = arith.constant 0 : i32
    %196 = arith.addi %171, %c0_i32_82 : i32
    %197 = vector.broadcast %196 : i32 to vector<8x1xi32>
    %198 = arith.cmpi slt, %197, %0 : vector<8x1xi32>
    %199 = vector.shape_cast %198 : vector<8x1xi1> to vector<8x1xi1>
    %200 = vector.broadcast %199 : vector<8x1xi1> to vector<8x128xi1>
    %201 = arith.select %200, %195, %170 : vector<8x128xi1>, vector<8x128xf32>
    %c1_83 = arith.constant 1 : index
    %c0_84 = arith.constant 0 : index
    %202 = tpu.strided_load %arg8[%c1_83, %c0_84] {strides = array<i32: 8, 1>} : memref<64x128xf32, #tpu.memory_space<vmem>>, vector<8x128xf32>
    %c1_i32_85 = arith.constant 1 : i32
    %203 = tpu.dynamic_rotate %201 by %c1_i32_85 dim 1 : vector<8x128xf32>, i32 -> vector<8x128xf32>
    %cst_86 = arith.constant -1.000000e+30 : f32
    %204 = vector.broadcast %cst_86 : f32 to vector<8x128xf32>
    %205 = arith.select %13, %203, %204 : vector<8x128xi1>, vector<8x128xf32>
    %c2_i32_87 = arith.constant 2 : i32
    %206 = tpu.dynamic_rotate %201 by %c2_i32_87 dim 1 : vector<8x128xf32>, i32 -> vector<8x128xf32>
    %cst_88 = arith.constant -1.000000e+30 : f32
    %207 = vector.broadcast %cst_88 : f32 to vector<8x128xf32>
    %208 = arith.select %11, %206, %207 : vector<8x128xi1>, vector<8x128xf32>
    %209 = arith.maximumf %201, %205 : vector<8x128xf32>
    %210 = arith.maximumf %209, %208 : vector<8x128xf32>
    %211 = arith.subf %201, %210 : vector<8x128xf32>
    %212 = math.exp %211 : vector<8x128xf32>
    %213 = arith.subf %205, %210 : vector<8x128xf32>
    %214 = math.exp %213 : vector<8x128xf32>
    %215 = arith.addf %212, %214 : vector<8x128xf32>
    %216 = arith.subf %208, %210 : vector<8x128xf32>
    %217 = math.exp %216 : vector<8x128xf32>
    %218 = arith.addf %215, %217 : vector<8x128xf32>
    %219 = math.log %218 : vector<8x128xf32>
    %220 = arith.addf %210, %219 : vector<8x128xf32>
    %cst_89 = arith.constant -5.000000e+29 : f32
    %221 = vector.broadcast %cst_89 : f32 to vector<8x128xf32>
    %222 = arith.cmpf ogt, %210, %221 : vector<8x128xf32>
    %cst_90 = arith.constant -1.000000e+30 : f32
    %223 = vector.broadcast %cst_90 : f32 to vector<8x128xf32>
    %224 = arith.select %222, %220, %223 : vector<8x128xi1>, vector<8x128xf32>
    %225 = arith.addf %224, %202 : vector<8x128xf32>
    %c1_i32_91 = arith.constant 1 : i32
    %226 = arith.addi %171, %c1_i32_91 : i32
    %227 = vector.broadcast %226 : i32 to vector<8x1xi32>
    %228 = arith.cmpi slt, %227, %0 : vector<8x1xi32>
    %229 = vector.shape_cast %228 : vector<8x1xi1> to vector<8x1xi1>
    %230 = vector.broadcast %229 : vector<8x1xi1> to vector<8x128xi1>
    %231 = arith.select %230, %225, %201 : vector<8x128xi1>, vector<8x128xf32>
    %c2_92 = arith.constant 2 : index
    %c0_93 = arith.constant 0 : index
    %232 = tpu.strided_load %arg8[%c2_92, %c0_93] {strides = array<i32: 8, 1>} : memref<64x128xf32, #tpu.memory_space<vmem>>, vector<8x128xf32>
    %c1_i32_94 = arith.constant 1 : i32
    %233 = tpu.dynamic_rotate %231 by %c1_i32_94 dim 1 : vector<8x128xf32>, i32 -> vector<8x128xf32>
    %cst_95 = arith.constant -1.000000e+30 : f32
    %234 = vector.broadcast %cst_95 : f32 to vector<8x128xf32>
    %235 = arith.select %13, %233, %234 : vector<8x128xi1>, vector<8x128xf32>
    %c2_i32_96 = arith.constant 2 : i32
    %236 = tpu.dynamic_rotate %231 by %c2_i32_96 dim 1 : vector<8x128xf32>, i32 -> vector<8x128xf32>
    %cst_97 = arith.constant -1.000000e+30 : f32
    %237 = vector.broadcast %cst_97 : f32 to vector<8x128xf32>
    %238 = arith.select %11, %236, %237 : vector<8x128xi1>, vector<8x128xf32>
    %239 = arith.maximumf %231, %235 : vector<8x128xf32>
    %240 = arith.maximumf %239, %238 : vector<8x128xf32>
    %241 = arith.subf %231, %240 : vector<8x128xf32>
    %242 = math.exp %241 : vector<8x128xf32>
    %243 = arith.subf %235, %240 : vector<8x128xf32>
    %244 = math.exp %243 : vector<8x128xf32>
    %245 = arith.addf %242, %244 : vector<8x128xf32>
    %246 = arith.subf %238, %240 : vector<8x128xf32>
    %247 = math.exp %246 : vector<8x128xf32>
    %248 = arith.addf %245, %247 : vector<8x128xf32>
    %249 = math.log %248 : vector<8x128xf32>
    %250 = arith.addf %240, %249 : vector<8x128xf32>
    %cst_98 = arith.constant -5.000000e+29 : f32
    %251 = vector.broadcast %cst_98 : f32 to vector<8x128xf32>
    %252 = arith.cmpf ogt, %240, %251 : vector<8x128xf32>
    %cst_99 = arith.constant -1.000000e+30 : f32
    %253 = vector.broadcast %cst_99 : f32 to vector<8x128xf32>
    %254 = arith.select %252, %250, %253 : vector<8x128xi1>, vector<8x128xf32>
    %255 = arith.addf %254, %232 : vector<8x128xf32>
    %c2_i32_100 = arith.constant 2 : i32
    %256 = arith.addi %171, %c2_i32_100 : i32
    %257 = vector.broadcast %256 : i32 to vector<8x1xi32>
    %258 = arith.cmpi slt, %257, %0 : vector<8x1xi32>
    %259 = vector.shape_cast %258 : vector<8x1xi1> to vector<8x1xi1>
    %260 = vector.broadcast %259 : vector<8x1xi1> to vector<8x128xi1>
    %261 = arith.select %260, %255, %231 : vector<8x128xi1>, vector<8x128xf32>
    %c3_101 = arith.constant 3 : index
    %c0_102 = arith.constant 0 : index
    %262 = tpu.strided_load %arg8[%c3_101, %c0_102] {strides = array<i32: 8, 1>} : memref<64x128xf32, #tpu.memory_space<vmem>>, vector<8x128xf32>
    %c1_i32_103 = arith.constant 1 : i32
    %263 = tpu.dynamic_rotate %261 by %c1_i32_103 dim 1 : vector<8x128xf32>, i32 -> vector<8x128xf32>
    %cst_104 = arith.constant -1.000000e+30 : f32
    %264 = vector.broadcast %cst_104 : f32 to vector<8x128xf32>
    %265 = arith.select %13, %263, %264 : vector<8x128xi1>, vector<8x128xf32>
    %c2_i32_105 = arith.constant 2 : i32
    %266 = tpu.dynamic_rotate %261 by %c2_i32_105 dim 1 : vector<8x128xf32>, i32 -> vector<8x128xf32>
    %cst_106 = arith.constant -1.000000e+30 : f32
    %267 = vector.broadcast %cst_106 : f32 to vector<8x128xf32>
    %268 = arith.select %11, %266, %267 : vector<8x128xi1>, vector<8x128xf32>
    %269 = arith.maximumf %261, %265 : vector<8x128xf32>
    %270 = arith.maximumf %269, %268 : vector<8x128xf32>
    %271 = arith.subf %261, %270 : vector<8x128xf32>
    %272 = math.exp %271 : vector<8x128xf32>
    %273 = arith.subf %265, %270 : vector<8x128xf32>
    %274 = math.exp %273 : vector<8x128xf32>
    %275 = arith.addf %272, %274 : vector<8x128xf32>
    %276 = arith.subf %268, %270 : vector<8x128xf32>
    %277 = math.exp %276 : vector<8x128xf32>
    %278 = arith.addf %275, %277 : vector<8x128xf32>
    %279 = math.log %278 : vector<8x128xf32>
    %280 = arith.addf %270, %279 : vector<8x128xf32>
    %cst_107 = arith.constant -5.000000e+29 : f32
    %281 = vector.broadcast %cst_107 : f32 to vector<8x128xf32>
    %282 = arith.cmpf ogt, %270, %281 : vector<8x128xf32>
    %cst_108 = arith.constant -1.000000e+30 : f32
    %283 = vector.broadcast %cst_108 : f32 to vector<8x128xf32>
    %284 = arith.select %282, %280, %283 : vector<8x128xi1>, vector<8x128xf32>
    %285 = arith.addf %284, %262 : vector<8x128xf32>
    %c3_i32 = arith.constant 3 : i32
    %286 = arith.addi %171, %c3_i32 : i32
    %287 = vector.broadcast %286 : i32 to vector<8x1xi32>
    %288 = arith.cmpi slt, %287, %0 : vector<8x1xi32>
    %289 = vector.shape_cast %288 : vector<8x1xi1> to vector<8x1xi1>
    %290 = vector.broadcast %289 : vector<8x1xi1> to vector<8x128xi1>
    %291 = arith.select %290, %285, %261 : vector<8x128xi1>, vector<8x128xf32>
    %c4_109 = arith.constant 4 : index
    %c0_110 = arith.constant 0 : index
    %292 = tpu.strided_load %arg8[%c4_109, %c0_110] {strides = array<i32: 8, 1>} : memref<64x128xf32, #tpu.memory_space<vmem>>, vector<8x128xf32>
    %c1_i32_111 = arith.constant 1 : i32
    %293 = tpu.dynamic_rotate %291 by %c1_i32_111 dim 1 : vector<8x128xf32>, i32 -> vector<8x128xf32>
    %cst_112 = arith.constant -1.000000e+30 : f32
    %294 = vector.broadcast %cst_112 : f32 to vector<8x128xf32>
    %295 = arith.select %13, %293, %294 : vector<8x128xi1>, vector<8x128xf32>
    %c2_i32_113 = arith.constant 2 : i32
    %296 = tpu.dynamic_rotate %291 by %c2_i32_113 dim 1 : vector<8x128xf32>, i32 -> vector<8x128xf32>
    %cst_114 = arith.constant -1.000000e+30 : f32
    %297 = vector.broadcast %cst_114 : f32 to vector<8x128xf32>
    %298 = arith.select %11, %296, %297 : vector<8x128xi1>, vector<8x128xf32>
    %299 = arith.maximumf %291, %295 : vector<8x128xf32>
    %300 = arith.maximumf %299, %298 : vector<8x128xf32>
    %301 = arith.subf %291, %300 : vector<8x128xf32>
    %302 = math.exp %301 : vector<8x128xf32>
    %303 = arith.subf %295, %300 : vector<8x128xf32>
    %304 = math.exp %303 : vector<8x128xf32>
    %305 = arith.addf %302, %304 : vector<8x128xf32>
    %306 = arith.subf %298, %300 : vector<8x128xf32>
    %307 = math.exp %306 : vector<8x128xf32>
    %308 = arith.addf %305, %307 : vector<8x128xf32>
    %309 = math.log %308 : vector<8x128xf32>
    %310 = arith.addf %300, %309 : vector<8x128xf32>
    %cst_115 = arith.constant -5.000000e+29 : f32
    %311 = vector.broadcast %cst_115 : f32 to vector<8x128xf32>
    %312 = arith.cmpf ogt, %300, %311 : vector<8x128xf32>
    %cst_116 = arith.constant -1.000000e+30 : f32
    %313 = vector.broadcast %cst_116 : f32 to vector<8x128xf32>
    %314 = arith.select %312, %310, %313 : vector<8x128xi1>, vector<8x128xf32>
    %315 = arith.addf %314, %292 : vector<8x128xf32>
    %c4_i32 = arith.constant 4 : i32
    %316 = arith.addi %171, %c4_i32 : i32
    %317 = vector.broadcast %316 : i32 to vector<8x1xi32>
    %318 = arith.cmpi slt, %317, %0 : vector<8x1xi32>
    %319 = vector.shape_cast %318 : vector<8x1xi1> to vector<8x1xi1>
    %320 = vector.broadcast %319 : vector<8x1xi1> to vector<8x128xi1>
    %321 = arith.select %320, %315, %291 : vector<8x128xi1>, vector<8x128xf32>
    %c5_117 = arith.constant 5 : index
    %c0_118 = arith.constant 0 : index
    %322 = tpu.strided_load %arg8[%c5_117, %c0_118] {strides = array<i32: 8, 1>} : memref<64x128xf32, #tpu.memory_space<vmem>>, vector<8x128xf32>
    %c1_i32_119 = arith.constant 1 : i32
    %323 = tpu.dynamic_rotate %321 by %c1_i32_119 dim 1 : vector<8x128xf32>, i32 -> vector<8x128xf32>
    %cst_120 = arith.constant -1.000000e+30 : f32
    %324 = vector.broadcast %cst_120 : f32 to vector<8x128xf32>
    %325 = arith.select %13, %323, %324 : vector<8x128xi1>, vector<8x128xf32>
    %c2_i32_121 = arith.constant 2 : i32
    %326 = tpu.dynamic_rotate %321 by %c2_i32_121 dim 1 : vector<8x128xf32>, i32 -> vector<8x128xf32>
    %cst_122 = arith.constant -1.000000e+30 : f32
    %327 = vector.broadcast %cst_122 : f32 to vector<8x128xf32>
    %328 = arith.select %11, %326, %327 : vector<8x128xi1>, vector<8x128xf32>
    %329 = arith.maximumf %321, %325 : vector<8x128xf32>
    %330 = arith.maximumf %329, %328 : vector<8x128xf32>
    %331 = arith.subf %321, %330 : vector<8x128xf32>
    %332 = math.exp %331 : vector<8x128xf32>
    %333 = arith.subf %325, %330 : vector<8x128xf32>
    %334 = math.exp %333 : vector<8x128xf32>
    %335 = arith.addf %332, %334 : vector<8x128xf32>
    %336 = arith.subf %328, %330 : vector<8x128xf32>
    %337 = math.exp %336 : vector<8x128xf32>
    %338 = arith.addf %335, %337 : vector<8x128xf32>
    %339 = math.log %338 : vector<8x128xf32>
    %340 = arith.addf %330, %339 : vector<8x128xf32>
    %cst_123 = arith.constant -5.000000e+29 : f32
    %341 = vector.broadcast %cst_123 : f32 to vector<8x128xf32>
    %342 = arith.cmpf ogt, %330, %341 : vector<8x128xf32>
    %cst_124 = arith.constant -1.000000e+30 : f32
    %343 = vector.broadcast %cst_124 : f32 to vector<8x128xf32>
    %344 = arith.select %342, %340, %343 : vector<8x128xi1>, vector<8x128xf32>
    %345 = arith.addf %344, %322 : vector<8x128xf32>
    %c5_i32 = arith.constant 5 : i32
    %346 = arith.addi %171, %c5_i32 : i32
    %347 = vector.broadcast %346 : i32 to vector<8x1xi32>
    %348 = arith.cmpi slt, %347, %0 : vector<8x1xi32>
    %349 = vector.shape_cast %348 : vector<8x1xi1> to vector<8x1xi1>
    %350 = vector.broadcast %349 : vector<8x1xi1> to vector<8x128xi1>
    %351 = arith.select %350, %345, %321 : vector<8x128xi1>, vector<8x128xf32>
    %c6_125 = arith.constant 6 : index
    %c0_126 = arith.constant 0 : index
    %352 = tpu.strided_load %arg8[%c6_125, %c0_126] {strides = array<i32: 8, 1>} : memref<64x128xf32, #tpu.memory_space<vmem>>, vector<8x128xf32>
    %c1_i32_127 = arith.constant 1 : i32
    %353 = tpu.dynamic_rotate %351 by %c1_i32_127 dim 1 : vector<8x128xf32>, i32 -> vector<8x128xf32>
    %cst_128 = arith.constant -1.000000e+30 : f32
    %354 = vector.broadcast %cst_128 : f32 to vector<8x128xf32>
    %355 = arith.select %13, %353, %354 : vector<8x128xi1>, vector<8x128xf32>
    %c2_i32_129 = arith.constant 2 : i32
    %356 = tpu.dynamic_rotate %351 by %c2_i32_129 dim 1 : vector<8x128xf32>, i32 -> vector<8x128xf32>
    %cst_130 = arith.constant -1.000000e+30 : f32
    %357 = vector.broadcast %cst_130 : f32 to vector<8x128xf32>
    %358 = arith.select %11, %356, %357 : vector<8x128xi1>, vector<8x128xf32>
    %359 = arith.maximumf %351, %355 : vector<8x128xf32>
    %360 = arith.maximumf %359, %358 : vector<8x128xf32>
    %361 = arith.subf %351, %360 : vector<8x128xf32>
    %362 = math.exp %361 : vector<8x128xf32>
    %363 = arith.subf %355, %360 : vector<8x128xf32>
    %364 = math.exp %363 : vector<8x128xf32>
    %365 = arith.addf %362, %364 : vector<8x128xf32>
    %366 = arith.subf %358, %360 : vector<8x128xf32>
    %367 = math.exp %366 : vector<8x128xf32>
    %368 = arith.addf %365, %367 : vector<8x128xf32>
    %369 = math.log %368 : vector<8x128xf32>
    %370 = arith.addf %360, %369 : vector<8x128xf32>
    %cst_131 = arith.constant -5.000000e+29 : f32
    %371 = vector.broadcast %cst_131 : f32 to vector<8x128xf32>
    %372 = arith.cmpf ogt, %360, %371 : vector<8x128xf32>
    %cst_132 = arith.constant -1.000000e+30 : f32
    %373 = vector.broadcast %cst_132 : f32 to vector<8x128xf32>
    %374 = arith.select %372, %370, %373 : vector<8x128xi1>, vector<8x128xf32>
    %375 = arith.addf %374, %352 : vector<8x128xf32>
    %c6_i32 = arith.constant 6 : i32
    %376 = arith.addi %171, %c6_i32 : i32
    %377 = vector.broadcast %376 : i32 to vector<8x1xi32>
    %378 = arith.cmpi slt, %377, %0 : vector<8x1xi32>
    %379 = vector.shape_cast %378 : vector<8x1xi1> to vector<8x1xi1>
    %380 = vector.broadcast %379 : vector<8x1xi1> to vector<8x128xi1>
    %381 = arith.select %380, %375, %351 : vector<8x128xi1>, vector<8x128xf32>
    %c7_133 = arith.constant 7 : index
    %c0_134 = arith.constant 0 : index
    %382 = tpu.strided_load %arg8[%c7_133, %c0_134] {strides = array<i32: 8, 1>} : memref<64x128xf32, #tpu.memory_space<vmem>>, vector<8x128xf32>
    %c1_i32_135 = arith.constant 1 : i32
    %383 = tpu.dynamic_rotate %381 by %c1_i32_135 dim 1 : vector<8x128xf32>, i32 -> vector<8x128xf32>
    %cst_136 = arith.constant -1.000000e+30 : f32
    %384 = vector.broadcast %cst_136 : f32 to vector<8x128xf32>
    %385 = arith.select %13, %383, %384 : vector<8x128xi1>, vector<8x128xf32>
    %c2_i32_137 = arith.constant 2 : i32
    %386 = tpu.dynamic_rotate %381 by %c2_i32_137 dim 1 : vector<8x128xf32>, i32 -> vector<8x128xf32>
    %cst_138 = arith.constant -1.000000e+30 : f32
    %387 = vector.broadcast %cst_138 : f32 to vector<8x128xf32>
    %388 = arith.select %11, %386, %387 : vector<8x128xi1>, vector<8x128xf32>
    %389 = arith.maximumf %381, %385 : vector<8x128xf32>
    %390 = arith.maximumf %389, %388 : vector<8x128xf32>
    %391 = arith.subf %381, %390 : vector<8x128xf32>
    %392 = math.exp %391 : vector<8x128xf32>
    %393 = arith.subf %385, %390 : vector<8x128xf32>
    %394 = math.exp %393 : vector<8x128xf32>
    %395 = arith.addf %392, %394 : vector<8x128xf32>
    %396 = arith.subf %388, %390 : vector<8x128xf32>
    %397 = math.exp %396 : vector<8x128xf32>
    %398 = arith.addf %395, %397 : vector<8x128xf32>
    %399 = math.log %398 : vector<8x128xf32>
    %400 = arith.addf %390, %399 : vector<8x128xf32>
    %cst_139 = arith.constant -5.000000e+29 : f32
    %401 = vector.broadcast %cst_139 : f32 to vector<8x128xf32>
    %402 = arith.cmpf ogt, %390, %401 : vector<8x128xf32>
    %cst_140 = arith.constant -1.000000e+30 : f32
    %403 = vector.broadcast %cst_140 : f32 to vector<8x128xf32>
    %404 = arith.select %402, %400, %403 : vector<8x128xi1>, vector<8x128xf32>
    %405 = arith.addf %404, %382 : vector<8x128xf32>
    %c7_i32 = arith.constant 7 : i32
    %406 = arith.addi %171, %c7_i32 : i32
    %407 = vector.broadcast %406 : i32 to vector<8x1xi32>
    %408 = arith.cmpi slt, %407, %0 : vector<8x1xi32>
    %409 = vector.shape_cast %408 : vector<8x1xi1> to vector<8x1xi1>
    %410 = vector.broadcast %409 : vector<8x1xi1> to vector<8x128xi1>
    %411 = arith.select %410, %405, %381 : vector<8x128xi1>, vector<8x128xf32>
    %c0_141 = arith.constant 0 : index
    %c0_142 = arith.constant 0 : index
    %412 = vector.load %arg7[%c0_141, %c0_142] : memref<8x128xf32, #tpu.memory_space<vmem>>, vector<8x128xf32>
    tpu.vector_store %arg7[%c0_141, %c0_142], %411 {strides = array<i32>} : memref<8x128xf32, #tpu.memory_space<vmem>>, vector<8x128xf32>,
    %c0_i32_143 = arith.constant 0 : i32
    %413 = arith.cmpi eq, %arg1, %c0_i32_143 : i32
    %414 = arith.extui %413 : i1 to i32
    %c0_i32_144 = arith.constant 0 : i32
    %415 = arith.cmpi ne, %414, %c0_i32_144 : i32
    scf.if %415 {
      %c1_i32_145 = arith.constant 1 : i32
      %416 = vector.broadcast %c1_i32_145 : i32 to vector<8x1xi32>
      %417 = arith.subi %1, %416 : vector<8x1xi32>
      %418 = vector.broadcast %417 : vector<8x1xi32> to vector<8x128xi32>
      %419 = arith.cmpi eq, %3, %418 : vector<8x128xi32>
      %cst_146 = arith.constant -1.000000e+30 : f32
      %420 = vector.broadcast %cst_146 : f32 to vector<8x128xf32>
      %421 = arith.select %419, %411, %420 : vector<8x128xi1>, vector<8x128xf32>
      %cst_147 = arith.constant dense<0xFF800000> : vector<8xf32>
      %422 = vector.multi_reduction <maximumf>, %421, %cst_147 [1] : vector<8x128xf32> to vector<8xf32>
      %423 = vector.shape_cast %422 : vector<8xf32> to vector<8x1xf32>
      %c2_i32_148 = arith.constant 2 : i32
      %424 = vector.broadcast %c2_i32_148 : i32 to vector<8x1xi32>
      %425 = arith.subi %1, %424 : vector<8x1xi32>
      %426 = vector.broadcast %425 : vector<8x1xi32> to vector<8x128xi32>
      %427 = arith.cmpi eq, %3, %426 : vector<8x128xi32>
      %cst_149 = arith.constant -1.000000e+30 : f32
      %428 = vector.broadcast %cst_149 : f32 to vector<8x128xf32>
      %429 = arith.select %427, %411, %428 : vector<8x128xi1>, vector<8x128xf32>
      %cst_150 = arith.constant dense<0xFF800000> : vector<8xf32>
      %430 = vector.multi_reduction <maximumf>, %429, %cst_150 [1] : vector<8x128xf32> to vector<8xf32>
      %431 = vector.shape_cast %430 : vector<8xf32> to vector<8x1xf32>
      %432 = arith.maximumf %423, %431 : vector<8x1xf32>
      %433 = arith.subf %423, %432 : vector<8x1xf32>
      %434 = math.exp %433 : vector<8x1xf32>
      %435 = arith.subf %431, %432 : vector<8x1xf32>
      %436 = math.exp %435 : vector<8x1xf32>
      %437 = arith.addf %434, %436 : vector<8x1xf32>
      %438 = math.log %437 : vector<8x1xf32>
      %439 = arith.addf %432, %438 : vector<8x1xf32>
      %cst_151 = arith.constant 0.000000e+00 : f32
      %440 = vector.broadcast %cst_151 : f32 to vector<8x1xf32>
      %441 = arith.subf %440, %439 : vector<8x1xf32>
      %442 = vector.shape_cast %441 : vector<8x1xf32> to vector<8x1xf32>
      %443 = vector.broadcast %442 : vector<8x1xf32> to vector<8x128xf32>
      %c0_152 = arith.constant 0 : index
      %c0_153 = arith.constant 0 : index
      %444 = vector.load %arg6[%c0_152, %c0_153] : memref<8x128xf32, #tpu.memory_space<vmem>>, vector<8x128xf32>
      tpu.vector_store %arg6[%c0_152, %c0_153], %443 {strides = array<i32>} : memref<8x128xf32, #tpu.memory_space<vmem>>, vector<8x128xf32>,
    } else {
    }
    return
  }
  func.func @transform_0(%arg0: i32, %arg1: i32) -> (i32, i32) {
    %c0_i32 = arith.constant 0 : i32
    %c0_i32_0 = arith.constant 0 : i32
    return %arg0, %c0_i32 : i32, i32
  }
  func.func @transform_1(%arg0: i32, %arg1: i32) -> (i32, i32) {
    %c0_i32 = arith.constant 0 : i32
    %c0_i32_0 = arith.constant 0 : i32
    return %arg0, %c0_i32 : i32, i32
  }
  func.func @transform_2(%arg0: i32, %arg1: i32) -> (i32, i32, i32) {
    %c0_i32 = arith.constant 0 : i32
    %c0_i32_0 = arith.constant 0 : i32
    return %arg0, %arg1, %c0_i32 : i32, i32, i32
  }
  func.func @transform_3(%arg0: i32, %arg1: i32) -> (i32, i32) {
    %c0_i32 = arith.constant 0 : i32
    %c0_i32_0 = arith.constant 0 : i32
    return %arg0, %c0_i32 : i32, i32
  }
  func.func @transform_4(%arg0: i32, %arg1: i32) -> (i32, i32) {
    %c0_i32 = arith.constant 0 : i32
    %c0_i32_0 = arith.constant 0 : i32
    return %arg0, %c0_i32 : i32, i32
  }
}

</mosaic_0001>

<bundles_post_ra>
// kernel: tpu_custom_call.1
= control target key start
LH: loop header
LB: loop body
LE: loop exit
PB: predicated region body
PF: predicated region fallthrough
CT: control target
= control target key end

     0   :  { %9 = vsyncpa [#allocation5], 0  ;;  %s2086_s0 = inlined_call_operand.vmem [shape: s32[8,1], index: 0, kind: input, shape index: {}]   ;;  %s2087_s1 = inlined_call_operand.vmem [shape: s32[8,1], index: 1, kind: input, shape index: {}]   ;;  %s2088_s2 = inlined_call_operand.hbm [shape: f32[8,8,32], index: 2, kind: input, shape index: {}]   ;;  %s2089_s3 = inlined_call_operand.vmem [shape: s32[8,128], index: 3, kind: input, shape index: {}]   ;;  %s2090_s4 = inlined_call_operand.hbm [shape: f32[8,128], index: 4, kind: output, shape index: {}]  }
   0x1   :  { %10 = vsyncpa [#allocation6], 0  ;;  %s1679_s15 = smov [#allocation4]   ;;  %s1631_s19 = scalar_lea.hbm %s2088_s2, 1024 }
   0x2   :  { %s20_s16 = sshll.u32 %s1679_s15, 4  ;;  %p1632_p0 = scmp.ne.s32.totalorder %s2088_s2, %s1631_s19  ;;  %s21_s16 = int_to_ptr.vmem [resolvable:$true] %s20_s16 }
   0x3   :  { %p1635_p1 = scmp.lt.u32.totalorder %s1631_s19, %s2088_s2 }
   0x5   :  { %p1637_p2 = pnand %p1635_p1, %p1632_p0 }
   0x7   :  { %1640 = shalt.err (!%p1637_p2)
}
   0x8   :  { %s1641_s24 = scalar_lea.vmem %s21_s16, 1024  ;;  %p1646_p4 = scmp.lt.s32.totalorder %s21_s16, %s21_s16 }
   0x9   :  { %p1642_p3 = scmp.ne.s32.totalorder %s21_s16, %s1641_s24  ;;  %p1647_p5 = scmp.lt.s32.totalorder %s1641_s24, %s1641_s24 }
   0xb   :  { %p1648_p6 = por %p1647_p5, %p1646_p4 }
   0xd   :  { %p1649_p7 = pnand %p1648_p6, %p1642_p3 }
   0xf   :  { %1652 = shalt.err (!%p1649_p7)
}
  0x10   :  { %s1680_s25 = smov 128   ;;  %s1681_s26 = smov 8  }
  0x11   :  { %26 = dma.hbm_to_vmem [thread:$0]  %s2088_s2, 1024, %s21_s16, [#allocation5], %s1680_s25, %s1680_s25, %s1681_s26  }
  0x12   :  { %1675 = dma.done.wait [#allocation5], 1024  }
  0x13   :  { %1676 = vsyncadd [#allocation5], 4294966272  ;;  %vm2093_vm0 = vcmask 261120   ;;  %v50_v0 = vld [vmem:[#allocation4] sm:$0xff]  ;;  %v261_v1 = vld [vmem:[#allocation4 + $0x10] sm:$0xff]  ;;  %v35_v56 = vlaneseq  ;;  %v1682_v60 = vmov 0.0|0.0  }
  0x14   :  { %v156_v2 = vld [vmem:[#allocation4 + $0x8] sm:$0xff]  ;;  %v52_v3 = vsel %vm2093_vm0, %v50_v0, -inf  ;;  %v262_v4 = vsel %vm2093_vm0, %v261_v1, -inf  ;;  %v366_v5 = vld [vmem:[#allocation4 + $0x18] sm:$0xff]  ;;  %v471_v8 = vld [vmem:[#allocation4 + $0x20] sm:$0xff]  ;;  %1467 = vmatprep.subr.bf16.mxu0 %v1682_v60  ;;  %1473 = vmatprep.subr.bf16.mxu1 %v1682_v60  ;;  %vm2091_vm12 = vmmov 0  }
  0x15   :  { %53 = vmax.xlane.f32.xlu0 %v52_v3  ;;  %263 = vmax.xlane.f32.xlu1 %v262_v4  ;;  %v157_v6 = vsel %vm2093_vm0, %v156_v2, -inf  ;;  %v367_v7 = vsel %vm2093_vm0, %v366_v5, -inf  ;;  %v576_v9 = vld [vmem:[#allocation4 + $0x28] sm:$0xff]  ;;  %v472_v10 = vsel %vm2093_vm0, %v471_v8, -inf  ;;  %v681_v12 = vld [vmem:[#allocation4 + $0x30] sm:$0xff]  ;;  %v786_v13 = vld [vmem:[#allocation4 + $0x38] sm:$0xff] }
  0x16   :  { %v577_v11 = vsel %vm2093_vm0, %v576_v9, -inf  ;;  %v682_v14 = vsel %vm2093_vm0, %v681_v12, -inf  ;;  %v787_v15 = vsel %vm2093_vm0, %v786_v13, -inf  ;;  %v1769_v57 = vshrl.u32 %v35_v56, 7  ;;  %v1249_v59 = vld [vmem:[%s2089_s3] ss:$0 sm:$0xff] }
  0x17   :  { %v1683_v61 = vmov 1.0|1.0   ;;  %v1279_v4 = vld [vmem:[%s2089_s3 + $0x3] ss:$0 sm:$0xff]  ;;  %s1686_s20 = smov 2  }
  0x18   :  { %v1772_v58 = vadd.s32 8, %v1769_v57  ;;  %vm69_vm1 = vcmp.eq.s32.totalorder %v1769_v57, %v1249_v59  ;;  %v1783_v62 = vadd.s32 16, %v1769_v57  ;;  %v1786_v63 = vadd.s32 24, %v1769_v57 }
  0x19   :  { %158 = vmax.xlane.f32.xlu0 %v157_v6  ;;  %368 = vmax.xlane.f32.xlu1 %v367_v7  ;;  %v1289_v7 = vld [vmem:[%s2089_s3 + $0x4] ss:$0 sm:$0xff] }
  0x1a   :  { %vm70_vm2 = vcmp.eq.s32.totalorder %v1772_v58, %v1249_v59  ;;  %vm71_vm4 = vcmp.eq.s32.totalorder %v1783_v62, %v1249_v59  ;;  %vm72_vm5 = vcmp.eq.s32.totalorder %v1786_v63, %v1249_v59 }
  0x1b   :  { %vm1468_vm3 = vmpackc.low %vm70_vm2, %vm69_vm1 }
  0x1c   :  { %1469 = vmatpush3.bf16.msk.msra.mxu0 %vm1468_vm3, %v1683_v61  ;;  %vm1471_vm8 = vmpackc.low %vm72_vm5, %vm71_vm4  ;;  %vm384_vm4 = vcmp.eq.s32.totalorder %v1769_v57, %v1279_v4  ;;  %vm385_vm5 = vcmp.eq.s32.totalorder %v1772_v58, %v1279_v4 }
  0x1d   :  { %473 = vmax.xlane.f32.xlu0 %v472_v10  ;;  %578 = vmax.xlane.f32.xlu1 %v577_v11  ;;  %v1299_v10 = vld [vmem:[%s2089_s3 + $0x5] ss:$0 sm:$0xff] }
  0x1e   :  { %1470 = vmatprep.subr.bf16.mxu0 %v1682_v60 }
  0x20   :  { %1472 = vmatpush3.bf16.msk.msra.mxu0 %vm1471_vm8, %v1683_v61  ;;  %vm386_vm8 = vcmp.eq.s32.totalorder %v1783_v62, %v1279_v4 }
  0x21   :  { %683 = vmax.xlane.f32.xlu0 %v682_v14  ;;  %788 = vmax.xlane.f32.xlu1 %v787_v15  ;;  %v2110_v15 = vmov 0 }
  0x22   :  { %1479 = vmatprep.subr.bf16.mxu0 %v1682_v60 }
  0xa2   :  { %v54_v16 = vpop.xlane.xlu0 %53  ;;  %v264_v17 = vpop.xlane.xlu1 %263 }
  0xa3   :  { %v1736_v18 = vsub.f32 %v50_v0, %v54_v16  ;;  %v1738_v19 = vsub.f32 %v261_v1, %v264_v17  ;;  %v1259_v0 = vld [vmem:[%s2089_s3 + $0x1] ss:$0 sm:$0xff]  ;;  %v1269_v1 = vld [vmem:[%s2089_s3 + $0x2] ss:$0 sm:$0xff]  ;;  %v1319_v16 = vld [vmem:[%s2089_s3 + $0x7] ss:$0 sm:$0xff] }
  0xa4   :  { %vm174_vm6 = vcmp.eq.s32.totalorder %v1769_v57, %v1259_v0  ;;  %vm175_vm7 = vcmp.eq.s32.totalorder %v1772_v58, %v1259_v0  ;;  %vm176_vm10 = vcmp.eq.s32.totalorder %v1783_v62, %v1259_v0  ;;  %vm177_vm11 = vcmp.eq.s32.totalorder %v1786_v63, %v1259_v0 }
  0xa5   :  { %v56_v20 = vmul.f32 1.442695, %v1736_v18  ;;  %v266_v21 = vmul.f32 1.442695, %v1738_v19  ;;  %vm1474_vm9 = vmpackc.low %vm175_vm7, %vm174_vm6  ;;  %vm279_vm14 = vcmp.eq.s32.totalorder %v1769_v57, %v1269_v1  ;;  %vm280_vm15 = vcmp.eq.s32.totalorder %v1772_v58, %v1269_v1 }
  0xa6   :  { %v159_v22 = vpop.xlane.xlu0 %158  ;;  %v369_v23 = vpop.xlane.xlu1 %368  ;;  %1475 = vmatpush3.bf16.msk.msra.mxu1 %vm1474_vm9, %v1683_v61  ;;  %vm1477_vm13 = vmpackc.low %vm177_vm11, %vm176_vm10  ;;  %vm281_vm2 = vcmp.eq.s32.totalorder %v1783_v62, %v1269_v1  ;;  %vm282_vm3 = vcmp.eq.s32.totalorder %v1786_v63, %v1269_v1  ;;  %vm387_vm9 = vcmp.eq.s32.totalorder %v1786_v63, %v1279_v4  ;;  %vm489_vm10 = vcmp.eq.s32.totalorder %v1769_v57, %v1289_v7 }
  0xa7   :  { %1529 = vpow2.f32 %v56_v20  ;;  %v1742_v24 = vsub.f32 %v156_v2, %v159_v22  ;;  %v1744_v25 = vsub.f32 %v366_v5, %v369_v23  ;;  %1476 = vmatprep.subr.bf16.mxu1 %v1682_v60  ;;  %v1685_v2 = vmov 0.0   ;;  %vm1811_vm1 = vmpackc.low %vm280_vm15, %vm279_vm14  ;;  %v1904_v23 = vld [vmem:[%s2089_s3] sm:$0xff] }
  0xa8   :  { %1531 = vpow2.f32 %v266_v21  ;;  %1387 = vmatprep.mubr.msk.f32.mxu0 %vm2091_vm12, %v1685_v2  ;;  %1398 = vmatprep.mubr.msk.f32.mxu1 %vm2091_vm12, %v1685_v2  ;;  %vm1824_vm6 = vmpackc.low %vm282_vm3, %vm281_vm2  ;;  %vm490_vm11 = vcmp.eq.s32.totalorder %v1772_v58, %v1289_v7  ;;  %vm491_vm15 = vcmp.eq.s32.totalorder %v1783_v62, %v1289_v7  ;;  %vm492_vm2 = vcmp.eq.s32.totalorder %v1786_v63, %v1289_v7 }
  0xa9   :  { %v161_v26 = vmul.f32 1.442695, %v1742_v24  ;;  %v371_v27 = vmul.f32 1.442695, %v1744_v25  ;;  %vm1828_vm7 = vmpackc.low %vm385_vm5, %vm384_vm4  ;;  %vm594_vm3 = vcmp.eq.s32.totalorder %v1769_v57, %v1299_v10  ;;  %vm595_vm4 = vcmp.eq.s32.totalorder %v1772_v58, %v1299_v10 }
  0xaa   :  { %v474_v28 = vpop.xlane.xlu0 %473  ;;  %v579_v29 = vpop.xlane.xlu1 %578  ;;  %1478 = vmatpush3.bf16.msk.msra.mxu1 %vm1477_vm13, %v1683_v61  ;;  %vm1839_vm13 = vmpackc.low %vm387_vm9, %vm386_vm8  ;;  %vm596_vm9 = vcmp.eq.s32.totalorder %v1783_v62, %v1299_v10  ;;  %v1899_v22 = vand.u32 127, %v35_v56 }
  0xab   :  { %1533 = vpow2.f32 %v161_v26  ;;  %v1748_v30 = vsub.f32 %v471_v8, %v474_v28  ;;  %v1750_v31 = vsub.f32 %v576_v9, %v579_v29  ;;  %1485 = vmatprep.subr.bf16.mxu1 %v1682_v60  ;;  %vm1843_vm14 = vmpackc.low %vm490_vm11, %vm489_vm10  ;;  %vm597_vm10 = vcmp.eq.s32.totalorder %v1786_v63, %v1299_v10  ;;  %v1916_v29 = vld [vmem:[%s2086_s0] sm:$0xff] }
  0xac   :  { %1535 = vpow2.f32 %v371_v27  ;;  %vm1854_vm5 = vmpackc.low %vm492_vm2, %vm491_vm15  ;;  %v1687_v26 = vmov 0   ;;  %v1688_v27 = vmov -1e+30  }
  0xad   :  { %v476_v32 = vmul.f32 1.442695, %v1748_v30  ;;  %v581_v33 = vmul.f32 1.442695, %v1750_v31  ;;  %vm1858_vm8 = vmpackc.low %vm595_vm4, %vm594_vm3  ;;  %1527 = vset.pattern.permute.xlu1 %v1687_v26  ;;  %1528 = vset.pattern.permute.xlu0 %v1687_v26 }
  0xae   :  { %v684_v34 = vpop.xlane.xlu0 %683  ;;  %v789_v35 = vpop.xlane.xlu1 %788  ;;  %vm1869_vm15 = vmpackc.low %vm597_vm10, %vm596_vm9  ;;  %vm806_vm10 = vcmp.eq.s32.totalorder %v1783_v62, %v1319_v16 }
  0xaf   :  { %1537 = vpow2.f32 %v476_v32  ;;  %v1754_v36 = vsub.f32 %v681_v12, %v684_v34  ;;  %v1756_v37 = vsub.f32 %v786_v13, %v789_v35  ;;  %v2106_v12 = vmov 0  ;;  %v1309_v13 = vld [vmem:[%s2089_s3 + $0x6] ss:$0 sm:$0xff]  ;;  %s1689_s3 = smov 1  }
  0xb0   :  { %1539 = vpow2.f32 %v581_v33  ;;  %v2107_v12 = vsel %vm1858_vm8, 4294967295, %v2106_v12  ;;  %vm699_vm11 = vcmp.eq.s32.totalorder %v1769_v57, %v1309_v13  ;;  %vm700_vm12 = vcmp.eq.s32.totalorder %v1772_v58, %v1309_v13 }
  0xb1   :  { %v1530_v38 = vpop.eup %1529  ;;  %v686_v39 = vmul.f32 1.442695, %v1754_v36  ;;  %v791_v40 = vmul.f32 1.442695, %v1756_v37  ;;  %vm1873_vm2 = vmpackc.low %vm700_vm12, %vm699_vm11  ;;  %vm701_vm3 = vcmp.eq.s32.totalorder %v1783_v62, %v1309_v13  ;;  %vm702_vm4 = vcmp.eq.s32.totalorder %v1786_v63, %v1309_v13 }
  0xb2   :  { %v1532_v41 = vpop.eup %1531  ;;  %v58_v42 = vsel %vm2093_vm0, %v1530_v38, 0.0  ;;  %v2111_v15 = vsel %vm1873_vm2, 4294967295, %v2110_v15  ;;  %vm805_vm8 = vcmp.eq.s32.totalorder %v1772_v58, %v1319_v16  ;;  %vm1884_vm9 = vmpackc.low %vm702_vm4, %vm701_vm3  ;;  %vm807_vm11 = vcmp.eq.s32.totalorder %v1786_v63, %v1319_v16 }
  0xb3   :  { %1541 = vpow2.f32 %v686_v39  ;;  %59 = vadd.xlane.f32.xlu0 %v58_v42  ;;  %v268_v43 = vsel %vm2093_vm0, %v1532_v41, 0.0  ;;  %vm1894_vm2 = vmpackc.low %vm807_vm11, %vm806_vm10  ;;  %vm2118_vm3 = vcmask 261120   ;;  %vm2119_vm4 = vmmov 0  }
  0xb4   :  { %1543 = vpow2.f32 %v791_v40  ;;  %vm2120_vm10 = vmmov %vm2118_vm3  ;;  %vm40_vm11 = vcmp.ne.s32.totalorder %v1904_v23, 31 }
  0xb5   :  { %v1534_v44 = vpop.eup %1533 }
  0xb6   :  { %v1536_v45 = vpop.eup %1535  ;;  %v163_v46 = vsel %vm2093_vm0, %v1534_v44, 0.0 }
  0xb7   :  { %269 = vadd.xlane.f32.xlu0 %v268_v43  ;;  %164 = vadd.xlane.f32.xlu1 %v163_v46  ;;  %v373_v47 = vsel %vm2093_vm0, %v1536_v45, 0.0 }
  0xb9   :  { %v1538_v48 = vpop.eup %1537 }
  0xba   :  { %v1540_v49 = vpop.eup %1539  ;;  %v478_v50 = vsel %vm2093_vm0, %v1538_v48, 0.0 }
  0xbb   :  { %374 = vadd.xlane.f32.xlu1 %v373_v47  ;;  %479 = vadd.xlane.f32.xlu0 %v478_v50  ;;  %v583_v51 = vsel %vm2093_vm0, %v1540_v49, 0.0 }
  0xbd   :  { %v1542_v52 = vpop.eup %1541 }
  0xbe   :  { %v1544_v53 = vpop.eup %1543  ;;  %v688_v54 = vsel %vm2093_vm0, %v1542_v52, 0.0 }
  0xbf   :  { %584 = vadd.xlane.f32.xlu1 %v583_v51  ;;  %689 = vadd.xlane.f32.xlu0 %v688_v54  ;;  %v793_v55 = vsel %vm2093_vm0, %v1544_v53, 0.0  ;;  %vm804_vm0 = vcmp.eq.s32.totalorder %v1769_v57, %v1319_v16 }
  0xc0   :  { %vm1888_vm12 = vmpackc.low %vm805_vm8, %vm804_vm0  ;;  %vm894_vm0 = vcmp.eq.s32.totalorder %v1899_v22, 0  ;;  %vm1329_vm8 = vcmp.gt.s32.totalorder %v1916_v29, 0 }
  0xc1   :  { %v1911_v28 = vsel %vm894_vm0, 0.0, %v1688_v27  ;;  %v929_v32 = vsel %vm1329_vm8, 1, %v1687_v26  ;;  %vm44_vm0 = vcmp.ge.s32.totalorder %v1899_v22, 1 }
  0xc3   :  { %794 = vadd.xlane.f32.xlu1 %v793_v55 }
  0xd4   :  { %902 = vrot.lane.b32.xlu1 %v1911_v28, %s1689_s3 }
  0xd5   :  { %37 = vrot.lane.b32.xlu0 %v1904_v23, %s1686_s20 }
  0xd8   :  { %905 = vrot.lane.b32.xlu1 %v1911_v28, %s1686_s20 }
  0xdc   :  { %931 = vperm.xlu1 %1527, %v929_v32  }
 0x140   :  { %v60_v33 = vpop.xlane.xlu0 %59 }
 0x141   :  { %1545 = vlog2.f32 %v60_v33 }
 0x144   :  { %v165_v34 = vpop.xlane.xlu1 %164  ;;  %v270_v35 = vpop.xlane.xlu0 %269 }
 0x145   :  { %1547 = vlog2.f32 %v165_v34 }
 0x146   :  { %1549 = vlog2.f32 %v270_v35 }
 0x148   :  { %v375_v38 = vpop.xlane.xlu1 %374  ;;  %v480_v39 = vpop.xlane.xlu0 %479 }
 0x149   :  { %1551 = vlog2.f32 %v375_v38 }
 0x14a   :  { %1553 = vlog2.f32 %v480_v39 }
 0x14b   :  { %v1546_v40 = vpop.eup %1545 }
 0x14c   :  { %v62_v41 = vmul.f32 0.6931472, %v1546_v40  ;;  %v585_v43 = vpop.xlane.xlu1 %584  ;;  %v690_v49 = vpop.xlane.xlu0 %689 }
 0x14d   :  { %1555 = vlog2.f32 %v585_v43 }
 0x14e   :  { %v63_v42 = vsub.f32 %v1736_v18, %v62_v41  ;;  %1557 = vlog2.f32 %v690_v49 }
 0x14f   :  { %v1548_v44 = vpop.eup %1547 }
 0x150   :  { %v1550_v45 = vpop.eup %1549  ;;  %v167_v46 = vmul.f32 0.6931472, %v1548_v44  ;;  %1388 = vmatmul.mubr.msk.f32.vlgmr.msra.gmra.mrb[0].mxu0 %vm2118_vm3, %v63_v42 }
 0x151   :  { %1481 = vmatpush3.bf16.msk.msra.mxu0 %vm1811_vm1, %v1683_v61  ;;  %1409 = vmatprep.mubr.msk.f32.mxu0 %vm2119_vm4, %v1685_v2  ;;  %v272_v48 = vmul.f32 0.6931472, %v1550_v45  ;;  %vm2121_vm1 = vmmov %vm2118_vm3 }
 0x152   :  { %v168_v47 = vsub.f32 %v1742_v24, %v167_v46  ;;  %1482 = vmatprep.subr.bf16.mxu0 %v1682_v60  ;;  %v795_v24 = vpop.xlane.xlu1 %794 }
 0x153   :  { %v1552_v18 = vpop.eup %1551  ;;  %v273_v50 = vsub.f32 %v1738_v19, %v272_v48  ;;  %1559 = vlog2.f32 %v795_v24 }
 0x154   :  { %1399 = vmatmul.mubr.msk.f32.vlgmr.msra.gmra.mrb[0].mxu1 %vm2120_vm10, %v168_v47  ;;  %v377_v51 = vmul.f32 0.6931472, %v1552_v18  ;;  %v1554_v52 = vpop.eup %1553 }
 0x155   :  { %1484 = vmatpush3.bf16.msk.msra.mxu0 %vm1824_vm6, %v1683_v61  ;;  %1487 = vmatpush3.bf16.msk.msra.mxu1 %vm1828_vm7, %v1683_v61  ;;  %v482_v53 = vmul.f32 0.6931472, %v1554_v52  ;;  %vm2122_vm6 = vmmov %vm2121_vm1  ;;  %vm2123_vm7 = vnez %v2107_v12 }
 0x156   :  { %1488 = vmatprep.subr.bf16.mxu1 %v1682_v60  ;;  %1491 = vmatprep.subr.bf16.mxu0 %v1682_v60  ;;  %v378_v19 = vsub.f32 %v1744_v25, %v377_v51  ;;  %v903_v63 = vpop.permute.xlu1 %902 }
 0x157   :  { %1420 = vmatprep.mubr.msk.f32.mxu1 %vm2119_vm4, %v1685_v2  ;;  %v1556_v54 = vpop.eup %1555  ;;  %v483_v25 = vsub.f32 %v1748_v30, %v482_v53 }
 0x158   :  { %1410 = vmatmul.mubr.msk.f32.vlgmr.msra.gmra.mrb[2].mxu0 %vm2121_vm1, %v273_v50  ;;  %v587_v55 = vmul.f32 0.6931472, %v1556_v54  ;;  %v1558_v56 = vpop.eup %1557 }
 0x159   :  { %1490 = vmatpush3.bf16.msk.msra.mxu1 %vm1839_vm13, %v1683_v61  ;;  %1493 = vmatpush3.bf16.msk.msra.mxu0 %vm1843_vm14, %v1683_v61  ;;  %vm2124_vm13 = vmmov %vm2121_vm1  ;;  %vm2125_vm14 = vnez %v2111_v15  ;;  %v692_v57 = vmul.f32 0.6931472, %v1558_v56 }
 0x15a   :  { %1494 = vmatprep.subr.bf16.mxu0 %v1682_v60  ;;  %1497 = vmatprep.subr.bf16.mxu1 %v1682_v60  ;;  %v588_v30 = vsub.f32 %v1750_v31, %v587_v55 }
 0x15b   :  { %1431 = vmatprep.mubr.msk.f32.mxu0 %vm2119_vm4, %v1685_v2  ;;  %v693_v31 = vsub.f32 %v1754_v36, %v692_v57  ;;  %v38_v36 = vpop.permute.xlu0 %37 }
 0x15c   :  { %1421 = vmatmul.mubr.msk.f32.vlgmr.msra.gmra.mrb[2].mxu1 %vm2122_vm6, %v378_v19  ;;  %vm42_vm3 = vcmp.ne.s32.totalorder %v1904_v23, %v38_v36  ;;  %vm1331_vm6 = vcmp.gt.s32.totalorder %v1916_v29, 2 }
 0x15d   :  { %1496 = vmatpush3.bf16.msk.msra.mxu0 %vm1854_vm5, %v1683_v61  ;;  %1499 = vmatpush3.bf16.msk.msra.mxu1 %vm2123_vm7, %v1683_v61  ;;  %v1560_v58 = vpop.eup %1559  ;;  %vm2126_vm5 = vmmov %vm2121_vm1  ;;  %v1005_v24 = vsel %vm1331_vm6, 1, %v1687_v26  ;;  %vm1335_vm6 = vcmp.gt.s32.totalorder %v1916_v29, 6 }
 0x15e   :  { %1500 = vmatprep.subr.bf16.mxu1 %v1682_v60  ;;  %1503 = vmatprep.subr.bf16.mxu0 %v1682_v60  ;;  %v797_v59 = vmul.f32 0.6931472, %v1560_v58 }
 0x15f   :  { %1442 = vmatprep.mubr.msk.f32.mxu1 %vm2119_vm4, %v1685_v2 }
 0x160   :  { %1432 = vmatmul.mubr.msk.f32.vlgmr.msra.gmra.mrb[4].mxu0 %vm2124_vm13, %v483_v25  ;;  %v798_v62 = vsub.f32 %v1756_v37, %v797_v59  ;;  %v906_v37 = vpop.permute.xlu1 %905 }
 0x161   :  { %1502 = vmatpush3.bf16.msk.msra.mxu1 %vm1869_vm15, %v1683_v61  ;;  %1505 = vmatpush3.bf16.msk.msra.mxu0 %vm2125_vm14, %v1683_v61  ;;  %vm2127_vm15 = vmmov %vm2121_vm1 }
 0x162   :  { %1506 = vmatprep.subr.bf16.mxu0 %v1682_v60  ;;  %1509 = vmatprep.subr.bf16.mxu1 %v1682_v60 }
 0x163   :  { %1453 = vmatprep.mubr.msk.f32.mxu0 %vm2119_vm4, %v1685_v2 }
 0x164   :  { %1443 = vmatmul.mubr.msk.f32.vlgmr.msra.gmra.mrb[4].mxu1 %vm2126_vm5, %v588_v30  ;;  %v932_v45 = vpop.permute.xlu1 %931 }
 0x165   :  { %1508 = vmatpush3.bf16.msk.msra.mxu0 %vm1884_vm9, %v1683_v61  ;;  %1511 = vmatpush3.bf16.msk.msra.mxu1 %vm1888_vm12, %v1683_v61  ;;  %vm2128_vm9 = vmmov %vm2121_vm1  ;;  %vm39_vm12 = vcmp.ge.s32.totalorder %v1899_v22, 2  ;;  %vm933_vm10 = vcmp.eq.s32.totalorder %v932_v45, 1  ;;  %vm1330_vm1 = vcmp.gt.s32.totalorder %v1916_v29, 1 }
 0x166   :  { %1512 = vmatprep.subr.bf16.mxu1 %v1682_v60  ;;  %1464 = vmatprep.mubr.msk.f32.mxu1 %vm2119_vm4, %v1685_v2  ;;  %vm41_vm8 = vmand %vm39_vm12, %vm40_vm11  ;;  %v904_v60 = vsel %vm44_vm0, %v903_v63, -1e+30  ;;  %v967_v51 = vsel %vm1330_vm1, 1, %v1687_v26  ;;  %vm1333_vm11 = vcmp.gt.s32.totalorder %v1916_v29, 4 }
 0x167   :  { %vm2004_vm4 = vmand %vm41_vm8, %vm42_vm3  ;;  %v908_v0 = vmax.f32 %v1911_v28, %v904_v60 }
 0x168   :  { %1454 = vmatmul.mubr.msk.f32.vlgmr.msra.gmra.mrb[6].mxu0 %vm2127_vm15, %v693_v31  ;;  %v907_v1 = vsel %vm2004_vm4, %v906_v37, -1e+30  ;;  %vm1332_vm15 = vcmp.gt.s32.totalorder %v1916_v29, 3 }
 0x169   :  { %1514 = vmatpush3.bf16.msk.msra.mxu1 %vm1894_vm2, %v1683_v61  ;;  %v909_v2 = vmax.f32 %v908_v0, %v907_v1 }
 0x16b   :  { %v910_v3 = vsub.f32 %v1911_v28, %v909_v2  ;;  %v913_v4 = vsub.f32 %v904_v60, %v909_v2  ;;  %v917_v7 = vsub.f32 %v907_v1, %v909_v2  ;;  %vm924_vm2 = vcmp.gt.f32.partialorder %v909_v2, -5e+29 }
 0x16c   :  { %1465 = vmatmul.mubr.msk.f32.vlgmr.msra.gmra.mrb[6].mxu1 %vm2128_vm9, %v798_v62 }
 0x16d   :  { %v911_v5 = vmul.f32 1.442695, %v910_v3  ;;  %v914_v6 = vmul.f32 1.442695, %v913_v4  ;;  %v918_v8 = vmul.f32 1.442695, %v917_v7 }
 0x16f   :  { %1561 = vpow2.f32 %v911_v5 }
 0x170   :  { %1563 = vpow2.f32 %v914_v6 }
 0x171   :  { %1565 = vpow2.f32 %v918_v8 }
 0x179   :  { %v1562_v12 = vpop.eup %1561 }
 0x17a   :  { %v1564_v14 = vpop.eup %1563 }
 0x17b   :  { %v916_v16 = vadd.f32 %v1564_v14, %v1562_v12  ;;  %v1566_v20 = vpop.eup %1565 }
 0x17d   :  { %v920_v23 = vadd.f32 %v1566_v20, %v916_v16 }
 0x17f   :  { %1567 = vlog2.f32 %v920_v23 }
 0x189   :  { %v1568_v40 = vpop.eup %1567 }
 0x18a   :  { %v922_v43 = vmul.f32 0.6931472, %v1568_v40 }
 0x18c   :  { %v923_v44 = vadd.f32 %v922_v43, %v909_v2 }
 0x18e   :  { %v925_v49 = vsel %vm924_vm2, %v923_v44, -1e+30  ;;  %vm1334_vm2 = vcmp.gt.s32.totalorder %v1916_v29, 5 }
 0x223   :  { %v150_v9 = vpop.f32.mrb[0].mxu0 }
 0x224   :  { %154 = vst [vmem:[#allocation3] sm:$0xff] %v150_v9  ;;  %v1389_v10 = vpop.f32.mrb[1].mxu0 }
 0x227   :  { %v255_v11 = vpop.f32.mrb[0].mxu1 }
 0x228   :  { %259 = vst [vmem:[#allocation3 + $0x8] sm:$0xff] %v255_v11  ;;  %v1400_v13 = vpop.f32.mrb[1].mxu1 }
 0x22b   :  { %v360_v15 = vpop.f32.mrb[2].mxu0 }
 0x22c   :  { %364 = vst [vmem:[#allocation3 + $0x10] sm:$0xff] %v360_v15  ;;  %v1411_v17 = vpop.f32.mrb[3].mxu0 }
 0x22f   :  { %v465_v21 = vpop.f32.mrb[2].mxu1 }
 0x230   :  { %469 = vst [vmem:[#allocation3 + $0x18] sm:$0xff] %v465_v21  ;;  %v1422_v27 = vpop.f32.mrb[3].mxu1 }
 0x233   :  { %v570_v32 = vpop.f32.mrb[4].mxu0 }
 0x234   :  { %574 = vst [vmem:[#allocation3 + $0x20] sm:$0xff] %v570_v32  ;;  %v1433_v33 = vpop.f32.mrb[5].mxu0 }
 0x237   :  { %v675_v34 = vpop.f32.mrb[4].mxu1  ;;  %v899_v46 = vld [vmem:[#allocation3] ss:$8 sm:$0xf] }
 0x238   :  { %679 = vst [vmem:[#allocation3 + $0x28] sm:$0xff] %v675_v34  ;;  %v1444_v35 = vpop.f32.mrb[5].mxu1  ;;  %v936_v2 = vld [vmem:[#allocation3 + $0x1] ss:$8 sm:$0xf] }
 0x23b   :  { %v780_v38 = vpop.f32.mrb[6].mxu0 }
 0x23c   :  { %784 = vst [vmem:[#allocation3 + $0x30] sm:$0xff] %v780_v38  ;;  %v1455_v39 = vpop.f32.mrb[7].mxu0 }
 0x23f   :  { %v885_v41 = vpop.f32.mrb[6].mxu1 }
 0x240   :  { %889 = vst [vmem:[#allocation3 + $0x38] sm:$0xff] %v885_v41  ;;  %v1466_v42 = vpop.f32.mrb[7].mxu1  ;;  %v974_v41 = vld [vmem:[#allocation3 + $0x2] ss:$8 sm:$0xf] }
 0x247   :  { %v900_v47 = vld [vmem:[#allocation3] ss:$8 sm:$0xf0]  ;;  %v937_v0 = vld [vmem:[#allocation3 + $0x1] ss:$8 sm:$0xf0] }
 0x248   :  { %v901_v48 = vor.u32 %v900_v47, %v899_v46  ;;  %v938_v4 = vor.u32 %v937_v0, %v936_v2  ;;  %v975_v39 = vld [vmem:[#allocation3 + $0x2] ss:$8 sm:$0xf0]  ;;  %v1165_v61 = vld [vmem:[#allocation3 + $0x7] ss:$8 sm:$0xf0] }
 0x249   :  { %v976_v44 = vor.u32 %v975_v39, %v974_v41 }
 0x24a   :  { %v926_v18 = vadd.f32 %v925_v49, %v901_v48  ;;  %v1043_v48 = vsel %vm1332_vm15, 1, %v1687_v26 }
 0x24c   :  { %v934_v50 = vsel %vm933_vm10, %v926_v18, %v1911_v28 }
 0x24d   :  { %942 = vrot.lane.b32.xlu1 %v934_v50, %s1686_s20  ;;  %939 = vrot.lane.b32.xlu0 %v934_v50, %s1689_s3 }
 0x251   :  { %969 = vperm.xlu0 %1528, %v967_v51  }
 0x255   :  { %1007 = vperm.xlu0 %1528, %v1005_v24  }
 0x2bf   :  { %v943_v52 = vpop.permute.xlu1 %942  ;;  %v940_v19 = vpop.permute.xlu0 %939 }
 0x2c0   :  { %v941_v53 = vsel %vm44_vm0, %v940_v19, -1e+30  ;;  %v944_v28 = vsel %vm2004_vm4, %v943_v52, -1e+30 }
 0x2c1   :  { %v945_v54 = vmax.f32 %v934_v50, %v941_v53 }
 0x2c3   :  { %v946_v25 = vmax.f32 %v945_v54, %v944_v28 }
 0x2c5   :  { %v947_v55 = vsub.f32 %v934_v50, %v946_v25  ;;  %v950_v56 = vsub.f32 %v941_v53, %v946_v25  ;;  %v954_v30 = vsub.f32 %v944_v28, %v946_v25  ;;  %vm961_vm7 = vcmp.gt.f32.partialorder %v946_v25, -5e+29 }
 0x2c7   :  { %v948_v57 = vmul.f32 1.442695, %v947_v55  ;;  %v951_v58 = vmul.f32 1.442695, %v950_v56  ;;  %v955_v31 = vmul.f32 1.442695, %v954_v30 }
 0x2c9   :  { %1569 = vpow2.f32 %v948_v57 }
 0x2ca   :  { %1571 = vpow2.f32 %v951_v58 }
 0x2cb   :  { %1573 = vpow2.f32 %v955_v31 }
 0x2d0   :  { %v970_v5 = vpop.permute.xlu0 %969 }
 0x2d1   :  { %vm971_vm13 = vcmp.eq.s32.totalorder %v970_v5, 1 }
 0x2d3   :  { %v1570_v59 = vpop.eup %1569 }
 0x2d4   :  { %v1572_v62 = vpop.eup %1571  ;;  %v1008_v43 = vpop.permute.xlu0 %1007 }
 0x2d5   :  { %v953_v63 = vadd.f32 %v1572_v62, %v1570_v59  ;;  %v1574_v36 = vpop.eup %1573  ;;  %vm1009_vm5 = vcmp.eq.s32.totalorder %v1008_v43, 1  ;;  %v1013_v62 = vld [vmem:[#allocation3 + $0x3] ss:$8 sm:$0xf0] }
 0x2d7   :  { %v957_v60 = vadd.f32 %v1574_v36, %v953_v63  ;;  %v1012_v36 = vld [vmem:[#allocation3 + $0x3] ss:$8 sm:$0xf] }
 0x2d9   :  { %1575 = vlog2.f32 %v957_v60 }
 0x2e3   :  { %v1576_v37 = vpop.eup %1575 }
 0x2e4   :  { %v959_v1 = vmul.f32 0.6931472, %v1576_v37  ;;  %v1014_v37 = vor.u32 %v1013_v62, %v1012_v36 }
 0x2e6   :  { %v960_v3 = vadd.f32 %v959_v1, %v946_v25 }
 0x2e8   :  { %v962_v6 = vsel %vm961_vm7, %v960_v3, -1e+30 }
 0x2e9   :  { %v963_v7 = vadd.f32 %v962_v6, %v938_v4  ;;  %v1081_v4 = vsel %vm1333_vm11, 1, %v1687_v26 }
 0x2eb   :  { %v972_v8 = vsel %vm971_vm13, %v963_v7, %v934_v50 }
 0x2ec   :  { %977 = vrot.lane.b32.xlu1 %v972_v8, %s1689_s3 }
 0x2f0   :  { %980 = vrot.lane.b32.xlu1 %v972_v8, %s1686_s20 }
 0x35e   :  { %v978_v9 = vpop.permute.xlu1 %977 }
 0x35f   :  { %v979_v10 = vsel %vm44_vm0, %v978_v9, -1e+30 }
 0x360   :  { %v983_v11 = vmax.f32 %v972_v8, %v979_v10 }
 0x362   :  { %v981_v12 = vpop.permute.xlu1 %980 }
 0x363   :  { %v982_v13 = vsel %vm2004_vm4, %v981_v12, -1e+30 }
 0x364   :  { %v984_v14 = vmax.f32 %v983_v11, %v982_v13 }
 0x366   :  { %v985_v15 = vsub.f32 %v972_v8, %v984_v14  ;;  %v988_v16 = vsub.f32 %v979_v10, %v984_v14  ;;  %v992_v17 = vsub.f32 %v982_v13, %v984_v14  ;;  %vm999_vm14 = vcmp.gt.f32.partialorder %v984_v14, -5e+29 }
 0x368   :  { %v986_v20 = vmul.f32 1.442695, %v985_v15  ;;  %v989_v21 = vmul.f32 1.442695, %v988_v16  ;;  %v993_v23 = vmul.f32 1.442695, %v992_v17 }
 0x36a   :  { %1577 = vpow2.f32 %v986_v20 }
 0x36b   :  { %1579 = vpow2.f32 %v989_v21 }
 0x36c   :  { %1581 = vpow2.f32 %v993_v23 }
 0x374   :  { %v1578_v27 = vpop.eup %1577 }
 0x375   :  { %v1580_v32 = vpop.eup %1579 }
 0x376   :  { %v991_v33 = vadd.f32 %v1580_v32, %v1578_v27  ;;  %v1582_v34 = vpop.eup %1581 }
 0x378   :  { %v995_v35 = vadd.f32 %v1582_v34, %v991_v33  ;;  %v1051_v33 = vld [vmem:[#allocation3 + $0x4] ss:$8 sm:$0xf0] }
 0x37a   :  { %1583 = vlog2.f32 %v995_v35  ;;  %v1050_v35 = vld [vmem:[#allocation3 + $0x4] ss:$8 sm:$0xf] }
 0x37b   :  { %v1052_v39 = vor.u32 %v1051_v33, %v1050_v35 }
 0x384   :  { %v1584_v38 = vpop.eup %1583 }
 0x385   :  { %v997_v40 = vmul.f32 0.6931472, %v1584_v38 }
 0x387   :  { %v998_v42 = vadd.f32 %v997_v40, %v984_v14 }
 0x389   :  { %v1000_v45 = vsel %vm999_vm14, %v998_v42, -1e+30  ;;  %vm1336_vm14 = vcmp.gt.s32.totalorder %v1916_v29, 7 }
 0x38a   :  { %v1001_v46 = vadd.f32 %v1000_v45, %v976_v44  ;;  %v1119_v44 = vsel %vm1334_vm2, 1, %v1687_v26 }
 0x38c   :  { %v1010_v47 = vsel %vm1009_vm5, %v1001_v46, %v972_v8 }
 0x38d   :  { %1018 = vrot.lane.b32.xlu0 %v1010_v47, %s1686_s20  ;;  %1015 = vrot.lane.b32.xlu1 %v1010_v47, %s1689_s3 }
 0x391   :  { %1045 = vperm.xlu1 %1527, %v1043_v48  }
 0x3ff   :  { %v1019_v49 = vpop.permute.xlu0 %1018  ;;  %v1016_v18 = vpop.permute.xlu1 %1015 }
 0x400   :  { %v1017_v50 = vsel %vm44_vm0, %v1016_v18, -1e+30  ;;  %v1020_v24 = vsel %vm2004_vm4, %v1019_v49, -1e+30 }
 0x401   :  { %v1021_v51 = vmax.f32 %v1010_v47, %v1017_v50 }
 0x403   :  { %v1022_v52 = vmax.f32 %v1021_v51, %v1020_v24 }
 0x405   :  { %v1023_v19 = vsub.f32 %v1010_v47, %v1022_v52  ;;  %v1026_v53 = vsub.f32 %v1017_v50, %v1022_v52  ;;  %v1030_v54 = vsub.f32 %v1020_v24, %v1022_v52  ;;  %vm1037_vm9 = vcmp.gt.f32.partialorder %v1022_v52, -5e+29 }
 0x407   :  { %v1024_v28 = vmul.f32 1.442695, %v1023_v19  ;;  %v1027_v25 = vmul.f32 1.442695, %v1026_v53  ;;  %v1031_v55 = vmul.f32 1.442695, %v1030_v54 }
 0x409   :  { %1585 = vpow2.f32 %v1024_v28 }
 0x40a   :  { %1587 = vpow2.f32 %v1027_v25 }
 0x40b   :  { %1589 = vpow2.f32 %v1031_v55 }
 0x410   :  { %v1046_v0 = vpop.permute.xlu1 %1045 }
 0x411   :  { %vm1047_vm12 = vcmp.eq.s32.totalorder %v1046_v0, 1  ;;  %v1157_v0 = vsel %vm1335_vm6, 1, %v1687_v26 }
 0x413   :  { %v1586_v56 = vpop.eup %1585 }
 0x414   :  { %v1588_v30 = vpop.eup %1587 }
 0x415   :  { %v1029_v57 = vadd.f32 %v1588_v30, %v1586_v56  ;;  %v1590_v58 = vpop.eup %1589 }
 0x417   :  { %v1033_v31 = vadd.f32 %v1590_v58, %v1029_v57  ;;  %v1089_v57 = vld [vmem:[#allocation3 + $0x5] ss:$8 sm:$0xf0] }
 0x419   :  { %1591 = vlog2.f32 %v1033_v31  ;;  %v1088_v31 = vld [vmem:[#allocation3 + $0x5] ss:$8 sm:$0xf] }
 0x41a   :  { %v1090_v62 = vor.u32 %v1089_v57, %v1088_v31 }
 0x423   :  { %v1592_v59 = vpop.eup %1591 }
 0x424   :  { %v1035_v63 = vmul.f32 0.6931472, %v1592_v59 }
 0x426   :  { %v1036_v60 = vadd.f32 %v1035_v63, %v1022_v52 }
 0x428   :  { %v1038_v1 = vsel %vm1037_vm9, %v1036_v60, -1e+30 }
 0x429   :  { %v1039_v2 = vadd.f32 %v1038_v1, %v1014_v37 }
 0x42b   :  { %v1048_v3 = vsel %vm1047_vm12, %v1039_v2, %v1010_v47 }
 0x42c   :  { %1056 = vrot.lane.b32.xlu1 %v1048_v3, %s1686_s20  ;;  %1053 = vrot.lane.b32.xlu0 %v1048_v3, %s1689_s3 }
 0x430   :  { %1083 = vperm.xlu0 %1528, %v1081_v4  }
 0x49e   :  { %v1057_v5 = vpop.permute.xlu1 %1056  ;;  %v1054_v6 = vpop.permute.xlu0 %1053 }
 0x49f   :  { %v1055_v7 = vsel %vm44_vm0, %v1054_v6, -1e+30  ;;  %v1058_v9 = vsel %vm2004_vm4, %v1057_v5, -1e+30 }
 0x4a0   :  { %v1059_v8 = vmax.f32 %v1048_v3, %v1055_v7 }
 0x4a2   :  { %v1060_v10 = vmax.f32 %v1059_v8, %v1058_v9 }
 0x4a4   :  { %v1061_v11 = vsub.f32 %v1048_v3, %v1060_v10  ;;  %v1064_v12 = vsub.f32 %v1055_v7, %v1060_v10  ;;  %v1068_v13 = vsub.f32 %v1058_v9, %v1060_v10  ;;  %vm1075_vm8 = vcmp.gt.f32.partialorder %v1060_v10, -5e+29 }
 0x4a6   :  { %v1062_v14 = vmul.f32 1.442695, %v1061_v11  ;;  %v1065_v15 = vmul.f32 1.442695, %v1064_v12  ;;  %v1069_v16 = vmul.f32 1.442695, %v1068_v13 }
 0x4a8   :  { %1593 = vpow2.f32 %v1062_v14 }
 0x4a9   :  { %1595 = vpow2.f32 %v1065_v15 }
 0x4aa   :  { %1597 = vpow2.f32 %v1069_v16 }
 0x4af   :  { %v1084_v40 = vpop.permute.xlu0 %1083 }
 0x4b0   :  { %vm1085_vm3 = vcmp.eq.s32.totalorder %v1084_v40, 1 }
 0x4b2   :  { %v1594_v17 = vpop.eup %1593 }
 0x4b3   :  { %v1596_v20 = vpop.eup %1595 }
 0x4b4   :  { %v1067_v21 = vadd.f32 %v1596_v20, %v1594_v17  ;;  %v1598_v23 = vpop.eup %1597 }
 0x4b6   :  { %v1071_v27 = vadd.f32 %v1598_v23, %v1067_v21  ;;  %v1127_v21 = vld [vmem:[#allocation3 + $0x6] ss:$8 sm:$0xf0] }
 0x4b8   :  { %1599 = vlog2.f32 %v1071_v27  ;;  %v1126_v27 = vld [vmem:[#allocation3 + $0x6] ss:$8 sm:$0xf] }
 0x4b9   :  { %v1128_v33 = vor.u32 %v1127_v21, %v1126_v27 }
 0x4c2   :  { %v1600_v32 = vpop.eup %1599 }
 0x4c3   :  { %v1073_v34 = vmul.f32 0.6931472, %v1600_v32 }
 0x4c5   :  { %v1074_v38 = vadd.f32 %v1073_v34, %v1060_v10 }
 0x4c7   :  { %v1076_v41 = vsel %vm1075_vm8, %v1074_v38, -1e+30 }
 0x4c8   :  { %v1077_v42 = vadd.f32 %v1076_v41, %v1052_v39  ;;  %v33_v39 = vld [vmem:[%s2087_s1] sm:$0xff]  ;;  %s1690_s1 = smov [#allocation7]  }
 0x4c9   :  { %v1337_v41 = vadd.s32 4294967295, %v33_v39  ;;  %s1240_s24 = sshll.u32 %s1690_s1, 4  ;;  %s1241_s24 = int_to_ptr.vmem [resolvable:$true] %s1240_s24 }
 0x4ca   :  { %v1086_v43 = vsel %vm1085_vm3, %v1077_v42, %v1048_v3  ;;  %v1195_v42 = vsel %vm1336_vm14, 1, %v1687_v26  ;;  %s1653_s25 = scalar_lea.vmem %s1241_s24, 128  ;;  %p1658_p9 = scmp.lt.s32.totalorder %s1241_s24, %s1241_s24 }
 0x4cb   :  { %1094 = vrot.lane.b32.xlu0 %v1086_v43, %s1686_s20  ;;  %1091 = vrot.lane.b32.xlu1 %v1086_v43, %s1689_s3  ;;  %p1654_p8 = scmp.ne.s32.totalorder %s1241_s24, %s1653_s25  ;;  %p1659_p10 = scmp.lt.s32.totalorder %s1653_s25, %s1653_s25 }
 0x4cd   :  { %p1660_p11 = por %p1659_p10, %p1658_p9 }
 0x4cf   :  { %1121 = vperm.xlu1 %1527, %v1119_v44   ;;  %p1661_p12 = pnand %p1660_p11, %p1654_p8 }
 0x53d   :  { %v1095_v45 = vpop.permute.xlu0 %1094  ;;  %v1092_v46 = vpop.permute.xlu1 %1091 }
 0x53e   :  { %v1093_v47 = vsel %vm44_vm0, %v1092_v46, -1e+30  ;;  %v1096_v49 = vsel %vm2004_vm4, %v1095_v45, -1e+30 }
 0x53f   :  { %v1097_v48 = vmax.f32 %v1086_v43, %v1093_v47 }
 0x541   :  { %v1098_v18 = vmax.f32 %v1097_v48, %v1096_v49 }
 0x543   :  { %v1099_v50 = vsub.f32 %v1086_v43, %v1098_v18  ;;  %v1102_v51 = vsub.f32 %v1093_v47, %v1098_v18  ;;  %v1106_v24 = vsub.f32 %v1096_v49, %v1098_v18  ;;  %vm1113_vm10 = vcmp.gt.f32.partialorder %v1098_v18, -5e+29 }
 0x545   :  { %v1100_v52 = vmul.f32 1.442695, %v1099_v50  ;;  %v1103_v19 = vmul.f32 1.442695, %v1102_v51  ;;  %v1107_v53 = vmul.f32 1.442695, %v1106_v24 }
 0x547   :  { %1601 = vpow2.f32 %v1100_v52 }
 0x548   :  { %1603 = vpow2.f32 %v1103_v19 }
 0x549   :  { %1605 = vpow2.f32 %v1107_v53 }
 0x54e   :  { %v1122_v63 = vpop.permute.xlu1 %1121 }
 0x54f   :  { %vm1123_vm1 = vcmp.eq.s32.totalorder %v1122_v63, 1 }
 0x551   :  { %v1602_v54 = vpop.eup %1601 }
 0x552   :  { %v1604_v28 = vpop.eup %1603 }
 0x553   :  { %v1105_v25 = vadd.f32 %v1604_v28, %v1602_v54  ;;  %v1606_v55 = vpop.eup %1605 }
 0x555   :  { %v1109_v56 = vadd.f32 %v1606_v55, %v1105_v25 }
 0x557   :  { %1607 = vlog2.f32 %v1109_v56 }
 0x561   :  { %v1608_v30 = vpop.eup %1607 }
 0x562   :  { %v1111_v58 = vmul.f32 0.6931472, %v1608_v30  ;;  %v1164_v30 = vld [vmem:[#allocation3 + $0x7] ss:$8 sm:$0xf] }
 0x564   :  { %v1112_v59 = vadd.f32 %v1111_v58, %v1098_v18  ;;  %v1166_v58 = vor.u32 %v1165_v61, %v1164_v30 }
 0x566   :  { %v1114_v36 = vsel %vm1113_vm10, %v1112_v59, -1e+30 }
 0x567   :  { %v1115_v60 = vadd.f32 %v1114_v36, %v1090_v62 }
 0x569   :  { %v1124_v37 = vsel %vm1123_vm1, %v1115_v60, %v1086_v43  ;;  %v1338_v43 = vadd.s32 4294967294, %v33_v39 }
 0x56a   :  { %1132 = vrot.lane.b32.xlu1 %v1124_v37, %s1686_s20  ;;  %1129 = vrot.lane.b32.xlu0 %v1124_v37, %s1689_s3 }
 0x56e   :  { %1159 = vperm.xlu0 %1528, %v1157_v0  }
 0x5dc   :  { %v1133_v1 = vpop.permute.xlu1 %1132  ;;  %v1130_v2 = vpop.permute.xlu0 %1129 }
 0x5dd   :  { %v1131_v3 = vsel %vm44_vm0, %v1130_v2, -1e+30  ;;  %v1134_v5 = vsel %vm2004_vm4, %v1133_v1, -1e+30 }
 0x5de   :  { %v1135_v4 = vmax.f32 %v1124_v37, %v1131_v3 }
 0x5e0   :  { %v1136_v6 = vmax.f32 %v1135_v4, %v1134_v5 }
 0x5e2   :  { %v1137_v7 = vsub.f32 %v1124_v37, %v1136_v6  ;;  %v1140_v8 = vsub.f32 %v1131_v3, %v1136_v6  ;;  %v1144_v9 = vsub.f32 %v1134_v5, %v1136_v6  ;;  %vm1151_vm7 = vcmp.gt.f32.partialorder %v1136_v6, -5e+29 }
 0x5e4   :  { %v1138_v10 = vmul.f32 1.442695, %v1137_v7  ;;  %v1141_v11 = vmul.f32 1.442695, %v1140_v8  ;;  %v1145_v12 = vmul.f32 1.442695, %v1144_v9 }
 0x5e6   :  { %1609 = vpow2.f32 %v1138_v10 }
 0x5e7   :  { %1611 = vpow2.f32 %v1141_v11 }
 0x5e8   :  { %1613 = vpow2.f32 %v1145_v12 }
 0x5ed   :  { %v1160_v34 = vpop.permute.xlu0 %1159 }
 0x5ee   :  { %vm1161_vm13 = vcmp.eq.s32.totalorder %v1160_v34, 1 }
 0x5f0   :  { %v1610_v13 = vpop.eup %1609 }
 0x5f1   :  { %v1612_v14 = vpop.eup %1611 }
 0x5f2   :  { %v1143_v15 = vadd.f32 %v1612_v14, %v1610_v13  ;;  %v1614_v16 = vpop.eup %1613 }
 0x5f4   :  { %v1147_v17 = vadd.f32 %v1614_v16, %v1143_v15 }
 0x5f6   :  { %1615 = vlog2.f32 %v1147_v17 }
 0x600   :  { %v1616_v20 = vpop.eup %1615 }
 0x601   :  { %v1149_v23 = vmul.f32 0.6931472, %v1616_v20 }
 0x603   :  { %v1150_v32 = vadd.f32 %v1149_v23, %v1136_v6 }
 0x605   :  { %v1152_v35 = vsel %vm1151_vm7, %v1150_v32, -1e+30 }
 0x606   :  { %v1153_v38 = vadd.f32 %v1152_v35, %v1128_v33 }
 0x608   :  { %v1162_v40 = vsel %vm1161_vm13, %v1153_v38, %v1124_v37 }
 0x609   :  { %1170 = vrot.lane.b32.xlu0 %v1162_v40, %s1686_s20  ;;  %1167 = vrot.lane.b32.xlu1 %v1162_v40, %s1689_s3 }
 0x60d   :  { %1207 = vperm.xlu0 %1528, %v1337_v41   ;;  %1197 = vperm.xlu1 %1527, %v1195_v42  }
 0x611   :  { %1215 = vperm.xlu1 %1527, %v1338_v43  }
 0x67b   :  { %v1171_v44 = vpop.permute.xlu0 %1170  ;;  %v1168_v45 = vpop.permute.xlu1 %1167 }
 0x67c   :  { %v1169_v46 = vsel %vm44_vm0, %v1168_v45, -1e+30  ;;  %v1172_v29 = vsel %vm2004_vm4, %v1171_v44, -1e+30 }
 0x67d   :  { %v1173_v47 = vmax.f32 %v1162_v40, %v1169_v46 }
 0x67f   :  { %v1174_v48 = vmax.f32 %v1173_v47, %v1172_v29 }
 0x681   :  { %v1175_v49 = vsub.f32 %v1162_v40, %v1174_v48  ;;  %v1178_v18 = vsub.f32 %v1169_v46, %v1174_v48  ;;  %v1182_v50 = vsub.f32 %v1172_v29, %v1174_v48  ;;  %vm1189_vm0 = vcmp.gt.f32.partialorder %v1174_v48, -5e+29 }
 0x683   :  { %v1176_v51 = vmul.f32 1.442695, %v1175_v49  ;;  %v1179_v24 = vmul.f32 1.442695, %v1178_v18  ;;  %v1183_v26 = vmul.f32 1.442695, %v1182_v50 }
 0x685   :  { %1617 = vpow2.f32 %v1176_v51 }
 0x686   :  { %1619 = vpow2.f32 %v1179_v24 }
 0x687   :  { %1621 = vpow2.f32 %v1183_v26 }
 0x68c   :  { %v1198_v25 = vpop.permute.xlu1 %1197  ;;  %v1208_v31 = vpop.permute.xlu0 %1207 }
 0x68d   :  { %vm1199_vm4 = vcmp.eq.s32.totalorder %v1198_v25, 1  ;;  %vm1209_vm5 = vcmp.eq.s32.totalorder %v1899_v22, %v1208_v31 }
 0x68f   :  { %v1618_v52 = vpop.eup %1617 }
 0x690   :  { %v1620_v19 = vpop.eup %1619  ;;  %v1216_v59 = vpop.permute.xlu1 %1215 }
 0x691   :  { %v1181_v53 = vadd.f32 %v1620_v19, %v1618_v52  ;;  %v1622_v54 = vpop.eup %1621  ;;  %vm1217_vm15 = vcmp.eq.s32.totalorder %v1899_v22, %v1216_v59 }
 0x693   :  { %v1185_v28 = vadd.f32 %v1622_v54, %v1181_v53 }
 0x695   :  { %1623 = vlog2.f32 %v1185_v28 }
 0x69f   :  { %v1624_v55 = vpop.eup %1623 }
 0x6a0   :  { %v1187_v56 = vmul.f32 0.6931472, %v1624_v55 }
 0x6a2   :  { %v1188_v57 = vadd.f32 %v1187_v56, %v1174_v48 }
 0x6a4   :  { %v1190_v62 = vsel %vm1189_vm0, %v1188_v57, -1e+30 }
 0x6a5   :  { %v1191_v63 = vadd.f32 %v1190_v62, %v1166_v58 }
 0x6a7   :  { %v1200_v36 = vsel %vm1199_vm4, %v1191_v63, %v1162_v40 }
 0x6a8   :  { %v1210_v60 = vsel %vm1209_vm5, %v1200_v36, -1e+30  ;;  %v1218_v37 = vsel %vm1217_vm15, %v1200_v36, -1e+30 }
 0x6a9   :  { %1211 = vmax.xlane.f32.xlu0 %v1210_v60  ;;  %1219 = vmax.xlane.f32.xlu1 %v1218_v37 }
 0x736   :  { %v1212_v0 = vpop.xlane.xlu0 %1211  ;;  %v1220_v1 = vpop.xlane.xlu1 %1219 }
 0x737   :  { %v1221_v2 = vmax.f32 %v1212_v0, %v1220_v1 }
 0x739   :  { %v1222_v3 = vsub.f32 %v1212_v0, %v1221_v2  ;;  %v1225_v4 = vsub.f32 %v1220_v1, %v1221_v2 }
 0x73b   :  { %v1223_v5 = vmul.f32 1.442695, %v1222_v3  ;;  %v1226_v6 = vmul.f32 1.442695, %v1225_v4 }
 0x73d   :  { %1625 = vpow2.f32 %v1223_v5 }
 0x73e   :  { %1627 = vpow2.f32 %v1226_v6 }
 0x747   :  { %v1626_v7 = vpop.eup %1625 }
 0x748   :  { %v1628_v8 = vpop.eup %1627 }
 0x749   :  { %v1228_v9 = vadd.f32 %v1628_v8, %v1626_v7 }
 0x74b   :  { %1629 = vlog2.f32 %v1228_v9 }
 0x755   :  { %v1630_v10 = vpop.eup %1629 }
 0x756   :  { %v1230_v22 = vmul.f32 0.6931472, %v1630_v10 }
 0x758   :  { %v1231_v11 = vadd.f32 %v1230_v22, %v1221_v2 }
 0x75a   :  { %v1232_v12 = vsub.f32 0.0, %v1231_v11 }
 0x75c   :  { %1233 = vst [vmem:[#allocation7] sm:$0xff] %v1232_v12 }
 0x75d   :  { %1664 = shalt.err (!%p1661_p12)
}
 0x75e   :  { %s1665_s28 = scalar_lea.hbm %s2090_s4, 128 }
 0x75f   :  { %p1666_p13 = scmp.ne.s32.totalorder %s2090_s4, %s1665_s28  ;;  %p1669_p0 = scmp.lt.u32.totalorder %s1665_s28, %s2090_s4 }
 0x761   :  { %p1671_p1 = pnand %p1669_p0, %p1666_p13 }
 0x763   :  { %1674 = shalt.err (!%p1671_p1)
}
 0x764   :  { %1243 = dma.vmem_to_hbm [thread:$0]  %s1241_s24, 128, %s2090_s4, [#allocation6]  }
 0x765   :  { %1677 = dma.done.wait [#allocation6], 128  }
 0x766   :  { %1678 = vsyncadd [#allocation6], 4294967168 }
 0x767   :  { %1247 = vsyncpa [#allocation5], 1 }
 0x768   :  { %1248 = vsyncpa [#allocation6], 1 }

</bundles_post_ra>
